<compile_context>
chip_gen: v6e
topology: v6e:2x2x1
jax: 0.10.0
libtpu: 0.0.40
codegen_flags: <defaults>
</compile_context>

<pallas_src>
import jax
import jax.numpy as jnp
from jax import lax
from jax.experimental import pallas as pl
from jax.experimental.pallas import tpu as pltpu


LANE = 128


def _round_up(x, m):
    return (x + m - 1) // m * m


def _pad_axis(a, axis, target):
    if a.shape[axis] == target:
        return a
    widths = [(0, 0)] * a.ndim
    widths[axis] = (0, target - a.shape[axis])
    return jnp.pad(a, widths)


def _choose_tiles(hw, n, tq=None, tk=None):
    """Pick (tq, tk, HWp). Prefers divisors of HW (zero padding); otherwise pads HW."""
    user_tq = tq is not None
    if tq is None:
        for t in (1024, 512, 256, 128):
            if hw % t == 0:
                tq = t
                break
        else:
            tq = min(1024, _round_up(hw, LANE))
    hwp = _round_up(hw, tq)
    if not user_tq:
        # v7x has 2 TensorCores sharing the parallel grid axes: make sure there are at
        # least two independent (batch, query-tile) work units when we can.
        while n * (hwp // tq) < 2 and tq >= 2 * LANE and hwp % (tq // 2) == 0:
            tq //= 2
    if tk is None:
        for t in (512, 256, 128):
            if hwp % t == 0:
                tk = t
                break
        else:
            tk = hwp
    assert hwp % tq == 0 and hwp % tk == 0, "tiles must divide padded HW"
    assert tq % 8 == 0 and tk % 8 == 0, "tiles must be sublane-aligned"
    return tq, tk, hwp


def _make_kernel(res_scale, c_valid, hw_valid, tk, fuse_l, mask_keys,
                 compute_dtype=jnp.bfloat16):
    def kernel(xq_ref, e2_ref, asm_ref,
               w1_ref, b1_ref, a1_ref,
               o_ref,
               e1_ref, m_ref, l_ref, acc_ref):
        ki = pl.program_id(2)
        nk = pl.num_programs(2)

        # ---- per-query-tile init: e1 projection (bf16 MXU) + online-softmax state ----
        @pl.when(ki == 0)
        def _init():
            xq = xq_ref[0].astype(compute_dtype)                              # (TQ, Cp) bf16
            e1 = jnp.dot(xq, w1_ref[...],
                         preferred_element_type=jnp.float32) + b1_ref[...]    # f32
            e1 = jnp.where(e1 >= 0, e1, a1_ref[...] * e1)                     # PReLU (f32)
            e1_ref[...] = e1.astype(e1_ref.dtype)
            m_ref[...] = jnp.full(m_ref.shape, -jnp.inf, dtype=m_ref.dtype)
            if not fuse_l:
                l_ref[...] = jnp.zeros(l_ref.shape, dtype=l_ref.dtype)
            acc_ref[...] = jnp.zeros(acc_ref.shape, dtype=acc_ref.dtype)

        # ---- score tile (TQ, TK) = e1 @ e2^T : bf16 MXU inputs, f32 accumulate ----
        s = lax.dot_general(e1_ref[...], e2_ref[0],
                            (((1,), (1,)), ((), ())),
                            preferred_element_type=jnp.float32)

        if mask_keys:
            # Padded key positions (global index >= HW) must not receive softmax mass.
            key_idx = ki * tk + lax.broadcasted_iota(jnp.int32, (1, tk), 1)
            s = jnp.where(key_idx < hw_valid, s, -1e30)

        # ---- online softmax with deferred normalization (state in f32) ----
        m_prev = m_ref[...]
        m_new = jnp.maximum(m_prev, jnp.max(s, axis=-1, keepdims=True))
        scale = jnp.exp(m_prev - m_new)
        p = jnp.exp(s - m_new).astype(compute_dtype)                          # bf16, once
        if not fuse_l:
            l_ref[...] = scale * l_ref[...] + jnp.sum(p.astype(jnp.float32),
                                                      axis=-1, keepdims=True)
        acc_ref[...] = scale * acc_ref[...] + jnp.dot(
            p, asm_ref[0], preferred_element_type=jnp.float32)
        m_ref[...] = m_new

        # ---- finalize: one reciprocal per row, add residual, lane-dense store ----
        @pl.when(ki == nk - 1)
        def _finalize():
            acc = acc_ref[...]
            if fuse_l:
                # Spare lane `c_valid` of asm carried ones -> that acc column is l.
                l = acc[:, c_valid:c_valid + 1]
            else:
                l = l_ref[...]
            inv_l = pl.reciprocal(l, approx=True)
            xq = xq_ref[0].astype(jnp.float32)
            o_ref[0] = (acc * inv_l + res_scale * xq).astype(o_ref.dtype)

    return kernel


def nonlocal_attention(x_nchw, params, res_scale=1.0, tq=None, tk=None):
    N, C, H, W = x_nchw.shape
    HW = H * W
    Cr = params["w1"].shape[1]

    Cp = _round_up(max(C, 1), LANE)
    Crp = _round_up(max(Cr, 1), LANE)
    tq, tk, HWp = _choose_tiles(HW, N, tq, tk)

    f32, bf16 = jnp.float32, jnp.bfloat16

    # NCHW -> (N, HW, C) tokens in the input's native dtype.
    x_tok = jnp.transpose(x_nchw, (0, 2, 3, 1)).reshape(N, HW, C)
    xf = x_tok.astype(f32)

    def prelu(v, a):
        return jnp.where(v >= 0, v, a * v)

    # Key-side 1x1-conv + PReLU projections hoisted out of the kernel (once per image,
    # f32 compute, streamed into the attention kernel as bf16).
    e2 = prelu(xf @ params["w2"].astype(f32) + params["b2"].astype(f32),
               params["a2"]).astype(bf16)                                     # (N, HW, Cr)
    asm = prelu(xf @ params["wa"].astype(f32) + params["ba"].astype(f32),
                params["aa"]).astype(bf16)                                    # (N, HW, C)

    # Pad tokens (HW -> HWp) and channels (-> lane multiples). Padded rows are zero and
    # padded key positions are masked to -1e30 inside the kernel.
    x_pad = _pad_axis(_pad_axis(x_tok, 1, HWp), 2, Cp)
    e2_pad = _pad_axis(_pad_axis(e2, 1, HWp), 2, Crp)
    asm_pad = _pad_axis(_pad_axis(asm, 1, HWp), 2, Cp)

    fuse_l = C < Cp
    if fuse_l:
        # Spare zero-padded lane C carries ones: the softmax denominator then comes out of
        # the accumulate matmul for free (no separate f32 row-sum over p).
        asm_pad = asm_pad.at[:, :, C].set(jnp.asarray(1.0, bf16))

    # Query projection weights: bf16 MXU inputs; bias / PReLU slope stay f32 rows.
    w1 = _pad_axis(_pad_axis(params["w1"].astype(bf16), 0, Cp), 1, Crp)
    b1 = _pad_axis(params["b1"].astype(f32).reshape(1, Cr), 1, Crp)
    a1 = jnp.full((1, Crp), params["a1"], f32)

    grid = (N, HWp // tq, HWp // tk)
    const = lambda n, qi, ki: (0, 0)

    out_tok = pl.pallas_call(
        _make_kernel(res_scale, C, HW, tk, fuse_l, mask_keys=(HWp > HW)),
        out_shape=jax.ShapeDtypeStruct((N, HWp, Cp), x_tok.dtype),
        grid_spec=pltpu.PrefetchScalarGridSpec(
            num_scalar_prefetch=0,
            grid=grid,
            in_specs=[
                pl.BlockSpec((1, tq, Cp), lambda n, qi, ki: (n, qi, 0)),   # x (query tile)
                pl.BlockSpec((1, tk, Crp), lambda n, qi, ki: (n, ki, 0)),  # e2 (key tile)
                pl.BlockSpec((1, tk, Cp), lambda n, qi, ki: (n, ki, 0)),   # asm (key tile)
                pl.BlockSpec((Cp, Crp), const),                            # w_match1 (bf16)
                pl.BlockSpec((1, Crp), const),                             # b_match1
                pl.BlockSpec((1, Crp), const),                             # PReLU slope 1
            ],
            out_specs=pl.BlockSpec((1, tq, Cp), lambda n, qi, ki: (n, qi, 0)),
            scratch_shapes=[
                pltpu.VMEM((tq, Crp), jnp.bfloat16),   # e1, resident across the key loop
                pltpu.VMEM((tq, 1), jnp.float32),      # running max m
                pltpu.VMEM((tq, 1), jnp.float32),      # running sum l (unused if fused)
                pltpu.VMEM((tq, Cp), jnp.float32),     # output accumulator
            ],
        ),
        compiler_params=pltpu.CompilerParams(
            # Batch & query-tile axes are independent (shardable across TCs on v7x);
            # the key axis carries the online-softmax accumulation.
            dimension_semantics=("parallel", "parallel", "arbitrary"),
            vmem_limit_bytes=32 * 1024 * 1024,
        ),
    )(x_pad, e2_pad, asm_pad, w1, b1, a1)

    out_tok = out_tok[:, :HW, :C]
    return jnp.transpose(out_tok.reshape(N, H, W, C), (0, 3, 1, 2))


def reference(x_nchw, params, res_scale=1.0):
    # Pure-JAX (f32) reference mirroring the PyTorch forward.
    N, C, H, W = x_nchw.shape
    x_tok = jnp.transpose(x_nchw, (0, 2, 3, 1)).reshape(N, H * W, C)

    def prelu(v, a):
        return jnp.where(v >= 0, v, a * v)

    e1 = prelu(x_tok @ params["w1"] + params["b1"], params["a1"])
    e2 = prelu(x_tok @ params["w2"] + params["b2"], params["a2"])
    asm = prelu(x_tok @ params["wa"] + params["ba"], params["aa"])
    score = jnp.einsum("nic,njc->nij", e1, e2)
    score = jax.nn.softmax(score, axis=-1)
    out = jnp.einsum("nij,njc->nic", score, asm) + res_scale * x_tok
    return jnp.transpose(out.reshape(N, H, W, C), (0, 3, 1, 2))


def init_params(key, channel, reduction):
    # Deterministic synthetic init (1x1 conv weights as (Cin, Cout) matrices,
    # PReLU default slope 0.25 — matches nn.PReLU() init).
    cr = channel // reduction
    k1, k2, k3, k4, k5, k6 = jax.random.split(key, 6)
    s = 1.0 / jnp.sqrt(channel)
    return {
        "w1": jax.random.uniform(k1, (channel, cr), jnp.float32, -s, s),
        "b1": jax.random.uniform(k2, (cr,), jnp.float32, -s, s),
        "w2": jax.random.uniform(k3, (channel, cr), jnp.float32, -s, s),
        "b2": jax.random.uniform(k4, (cr,), jnp.float32, -s, s),
        "wa": jax.random.uniform(k5, (channel, channel), jnp.float32, -s, s),
        "ba": jax.random.uniform(k6, (channel,), jnp.float32, -s, s),
        "a1": 0.25,
        "a2": 0.25,
        "aa": 0.25,
    }


if __name__ == "__main__":
    key = jax.random.PRNGKey(0)
    kx1, kx2, kx3, kp1, kp2 = jax.random.split(key, 5)

    # Case 1: channel=4, reduction=2, 16x16; tiles forced to 128 so the demo exercises
    # multiple key steps of the online-softmax accumulation (fused-denominator path).
    x1 = jax.random.normal(kx1, (2, 4, 16, 16), dtype=jnp.float32)
    p1 = init_params(kp1, 4, reduction=2)
    out1 = jax.block_until_ready(nonlocal_attention(x1, p1, res_scale=1.0, tq=128, tk=128))
    ref1 = jax.block_until_ready(reference(x1, p1, res_scale=1.0))
    assert out1.shape == x1.shape
    assert jnp.allclose(out1, ref1, atol=5e-2, rtol=5e-2), "case 1 mismatch vs reference"

    # Case 2: 12x12 -> HW=144 (not lane-aligned); exercises the padded-HW / masked-key path
    # with automatic tile selection.
    x2 = jax.random.normal(kx2, (1, 4, 12, 12), dtype=jnp.float32)
    out2 = jax.block_until_ready(nonlocal_attention(x2, p1, res_scale=1.0))
    ref2 = jax.block_until_ready(reference(x2, p1, res_scale=1.0))
    assert out2.shape == x2.shape
    assert jnp.allclose(out2, ref2, atol=5e-2, rtol=5e-2), "case 2 mismatch vs reference"

    # Case 3: channel=128 (module default; exact lane multiple) -> explicit l-reduce path.
    x3 = jax.random.normal(kx3, (1, 128, 8, 8), dtype=jnp.float32)
    p3 = init_params(kp2, 128, reduction=2)
    out3 = jax.block_until_ready(nonlocal_attention(x3, p3, res_scale=1.0))
    ref3 = jax.block_until_ready(reference(x3, p3, res_scale=1.0))
    assert out3.shape == x3.shape
    assert jnp.allclose(out3, ref3, atol=5e-2, rtol=5e-2), "case 3 mismatch vs reference"

    print("KERNEL_OK")
</pallas_src>

<mosaic_0001>
module attributes {stable_mosaic.version = 11 : i64} {
  func.func @kernel(%arg0: i32, %arg1: i32, %arg2: i32, %arg3: memref<1x128x128xf32, #tpu.memory_space<vmem>>, %arg4: memref<1x128x128xbf16, #tpu.memory_space<vmem>>, %arg5: memref<1x128x128xbf16, #tpu.memory_space<vmem>>, %arg6: memref<128x128xbf16, #tpu.memory_space<vmem>>, %arg7: memref<1x128xf32, #tpu.memory_space<vmem>>, %arg8: memref<1x128xf32, #tpu.memory_space<vmem>>, %arg9: memref<1x128x128xf32, #tpu.memory_space<vmem>>, %arg10: memref<128x128xbf16, #tpu.memory_space<vmem>>, %arg11: memref<128x1xf32, #tpu.memory_space<vmem>>, %arg12: memref<128x1xf32, #tpu.memory_space<vmem>>, %arg13: memref<128x128xf32, #tpu.memory_space<vmem>>) attributes {dimension_semantics = [#tpu.dimension_semantics<parallel>, #tpu.dimension_semantics<parallel>, #tpu.dimension_semantics<arbitrary>], iteration_bounds = array<i64: 2, 2, 2>, scalar_prefetch = 0 : i64, scratch_operands = 4 : i64, tpu.core_type = #tpu.core_type<tc>, window_params = [{transform_indices = @transform_0, window_bounds = array<i64: 1, 128, 128>}, {transform_indices = @transform_1, window_bounds = array<i64: 1, 128, 128>}, {transform_indices = @transform_2, window_bounds = array<i64: 1, 128, 128>}, {pipeline_mode = #tpu.pipeline_mode<synchronous>, transform_indices = @transform_3, window_bounds = array<i64: 128, 128>}, {pipeline_mode = #tpu.pipeline_mode<synchronous>, transform_indices = @transform_4, window_bounds = array<i64: 1, 128>}, {pipeline_mode = #tpu.pipeline_mode<synchronous>, transform_indices = @transform_5, window_bounds = array<i64: 1, 128>}, {transform_indices = @transform_6, window_bounds = array<i64: 1, 128, 128>}]} {
    %c0_i32 = arith.constant 0 : i32
    %0 = arith.cmpi eq, %arg2, %c0_i32 : i32
    %1 = arith.extui %0 : i1 to i32
    %c0_i32_0 = arith.constant 0 : i32
    %2 = arith.cmpi ne, %1, %c0_i32_0 : i32
    scf.if %2 {
      %c0_19 = arith.constant 0 : index
      %c0_20 = arith.constant 0 : index
      %c0_21 = arith.constant 0 : index
      %29 = vector.load %arg3[%c0_19, %c0_20, %c0_21] : memref<1x128x128xf32, #tpu.memory_space<vmem>>, vector<1x128x128xf32>
      %30 = vector.shape_cast %29 : vector<1x128x128xf32> to vector<128x128xf32>
      %31 = arith.truncf %30 : vector<128x128xf32> to vector<128x128xbf16>
      %c0_22 = arith.constant 0 : index
      %c0_23 = arith.constant 0 : index
      %32 = vector.load %arg6[%c0_22, %c0_23] : memref<128x128xbf16, #tpu.memory_space<vmem>>, vector<128x128xbf16>
      %cst_24 = arith.constant dense<0.000000e+00> : vector<128x128xf32>
      %33 = tpu.matmul %31, %32, %cst_24 {dimension_numbers = #tpu.dot_dimension_numbers<[1], [0], [0], [1], [0, 0, 1, 1], [], []>} : vector<128x128xbf16>, vector<128x128xbf16>, vector<128x128xf32> -> vector<128x128xf32>
      %c0_25 = arith.constant 0 : index
      %c0_26 = arith.constant 0 : index
      %34 = vector.load %arg7[%c0_25, %c0_26] : memref<1x128xf32, #tpu.memory_space<vmem>>, vector<1x128xf32>
      %35 = vector.broadcast %34 : vector<1x128xf32> to vector<128x128xf32>
      %36 = arith.addf %33, %35 : vector<128x128xf32>
      %cst_27 = arith.constant 0.000000e+00 : f32
      %37 = vector.broadcast %cst_27 : f32 to vector<128x128xf32>
      %38 = arith.cmpf oge, %36, %37 : vector<128x128xf32>
      %c0_28 = arith.constant 0 : index
      %c0_29 = arith.constant 0 : index
      %39 = vector.load %arg8[%c0_28, %c0_29] : memref<1x128xf32, #tpu.memory_space<vmem>>, vector<1x128xf32>
      %40 = vector.broadcast %39 : vector<1x128xf32> to vector<128x128xf32>
      %41 = arith.mulf %40, %36 : vector<128x128xf32>
      %42 = arith.select %38, %36, %41 : vector<128x128xi1>, vector<128x128xf32>
      %43 = arith.truncf %42 : vector<128x128xf32> to vector<128x128xbf16>
      %c0_30 = arith.constant 0 : index
      %c0_31 = arith.constant 0 : index
      %44 = vector.load %arg10[%c0_30, %c0_31] : memref<128x128xbf16, #tpu.memory_space<vmem>>, vector<128x128xbf16>
      tpu.vector_store %arg10[%c0_30, %c0_31], %43 {strides = array<i32>} : memref<128x128xbf16, #tpu.memory_space<vmem>>, vector<128x128xbf16>,
      %cst_32 = arith.constant 0xFF800000 : f32
      %45 = vector.broadcast %cst_32 : f32 to vector<128x1xf32>
      %c0_33 = arith.constant 0 : index
      %c0_34 = arith.constant 0 : index
      %46 = vector.load %arg11[%c0_33, %c0_34] : memref<128x1xf32, #tpu.memory_space<vmem>>, vector<128x1xf32>
      tpu.vector_store %arg11[%c0_33, %c0_34], %45 {strides = array<i32>} : memref<128x1xf32, #tpu.memory_space<vmem>>, vector<128x1xf32>,
      %cst_35 = arith.constant 0.000000e+00 : f32
      %47 = vector.broadcast %cst_35 : f32 to vector<128x128xf32>
      %c0_36 = arith.constant 0 : index
      %c0_37 = arith.constant 0 : index
      %48 = vector.load %arg13[%c0_36, %c0_37] : memref<128x128xf32, #tpu.memory_space<vmem>>, vector<128x128xf32>
      tpu.vector_store %arg13[%c0_36, %c0_37], %47 {strides = array<i32>} : memref<128x128xf32, #tpu.memory_space<vmem>>, vector<128x128xf32>,
    } else {
    }
    %c0 = arith.constant 0 : index
    %c0_1 = arith.constant 0 : index
    %3 = vector.load %arg10[%c0, %c0_1] : memref<128x128xbf16, #tpu.memory_space<vmem>>, vector<128x128xbf16>
    %c0_2 = arith.constant 0 : index
    %c0_3 = arith.constant 0 : index
    %c0_4 = arith.constant 0 : index
    %4 = vector.load %arg4[%c0_2, %c0_3, %c0_4] : memref<1x128x128xbf16, #tpu.memory_space<vmem>>, vector<1x128x128xbf16>
    %5 = vector.shape_cast %4 : vector<1x128x128xbf16> to vector<128x128xbf16>
    %cst = arith.constant dense<0.000000e+00> : vector<128x128xf32>
    %6 = tpu.matmul %3, %5, %cst {dimension_numbers = #tpu.dot_dimension_numbers<[1], [1], [0], [0], [0, 0, 1, 0], [], []>} : vector<128x128xbf16>, vector<128x128xbf16>, vector<128x128xf32> -> vector<128x128xf32>
    %c0_5 = arith.constant 0 : index
    %c0_6 = arith.constant 0 : index
    %7 = vector.load %arg11[%c0_5, %c0_6] : memref<128x1xf32, #tpu.memory_space<vmem>>, vector<128x1xf32>
    %cst_7 = arith.constant dense<0xFF800000> : vector<128xf32>
    %8 = vector.multi_reduction <maximumf>, %6, %cst_7 [1] : vector<128x128xf32> to vector<128xf32>
    %9 = vector.shape_cast %8 : vector<128xf32> to vector<128x1xf32>
    %10 = arith.maximumf %7, %9 : vector<128x1xf32>
    %11 = arith.subf %7, %10 : vector<128x1xf32>
    %12 = math.exp %11 : vector<128x1xf32>
    %13 = vector.broadcast %10 : vector<128x1xf32> to vector<128x128xf32>
    %14 = arith.subf %6, %13 : vector<128x128xf32>
    %15 = math.exp %14 : vector<128x128xf32>
    %16 = arith.truncf %15 : vector<128x128xf32> to vector<128x128xbf16>
    %c0_8 = arith.constant 0 : index
    %c0_9 = arith.constant 0 : index
    %17 = vector.load %arg13[%c0_8, %c0_9] : memref<128x128xf32, #tpu.memory_space<vmem>>, vector<128x128xf32>
    %18 = vector.broadcast %12 : vector<128x1xf32> to vector<128x128xf32>
    %19 = arith.mulf %18, %17 : vector<128x128xf32>
    %c0_10 = arith.constant 0 : index
    %c0_11 = arith.constant 0 : index
    %c0_12 = arith.constant 0 : index
    %20 = vector.load %arg5[%c0_10, %c0_11, %c0_12] : memref<1x128x128xbf16, #tpu.memory_space<vmem>>, vector<1x128x128xbf16>
    %21 = vector.shape_cast %20 : vector<1x128x128xbf16> to vector<128x128xbf16>
    %cst_13 = arith.constant dense<0.000000e+00> : vector<128x128xf32>
    %22 = tpu.matmul %16, %21, %cst_13 {dimension_numbers = #tpu.dot_dimension_numbers<[1], [0], [0], [1], [0, 0, 1, 1], [], []>} : vector<128x128xbf16>, vector<128x128xbf16>, vector<128x128xf32> -> vector<128x128xf32>
    %23 = arith.addf %19, %22 : vector<128x128xf32>
    %c0_14 = arith.constant 0 : index
    %c0_15 = arith.constant 0 : index
    %24 = vector.load %arg13[%c0_14, %c0_15] : memref<128x128xf32, #tpu.memory_space<vmem>>, vector<128x128xf32>
    tpu.vector_store %arg13[%c0_14, %c0_15], %23 {strides = array<i32>} : memref<128x128xf32, #tpu.memory_space<vmem>>, vector<128x128xf32>,
    %c0_16 = arith.constant 0 : index
    %c0_17 = arith.constant 0 : index
    %25 = vector.load %arg11[%c0_16, %c0_17] : memref<128x1xf32, #tpu.memory_space<vmem>>, vector<128x1xf32>
    tpu.vector_store %arg11[%c0_16, %c0_17], %10 {strides = array<i32>} : memref<128x1xf32, #tpu.memory_space<vmem>>, vector<128x1xf32>,
    %c1_i32 = arith.constant 1 : i32
    %26 = arith.cmpi eq, %arg2, %c1_i32 : i32
    %27 = arith.extui %26 : i1 to i32
    %c0_i32_18 = arith.constant 0 : i32
    %28 = arith.cmpi ne, %27, %c0_i32_18 : i32
    scf.if %28 {
      %c0_19 = arith.constant 0 : index
      %c0_20 = arith.constant 0 : index
      %29 = vector.load %arg13[%c0_19, %c0_20] : memref<128x128xf32, #tpu.memory_space<vmem>>, vector<128x128xf32>
      %30 = vector.extract_strided_slice %29 {offsets = [0, 4], sizes = [128, 1], strides = [1, 1]} : vector<128x128xf32> to vector<128x1xf32>
      %31 = tpu.reciprocal %30 {approx = true} : vector<128x1xf32> -> vector<128x1xf32>
      %c0_21 = arith.constant 0 : index
      %c0_22 = arith.constant 0 : index
      %c0_23 = arith.constant 0 : index
      %32 = vector.load %arg3[%c0_21, %c0_22, %c0_23] : memref<1x128x128xf32, #tpu.memory_space<vmem>>, vector<1x128x128xf32>
      %33 = vector.shape_cast %32 : vector<1x128x128xf32> to vector<128x128xf32>
      %34 = vector.broadcast %31 : vector<128x1xf32> to vector<128x128xf32>
      %35 = arith.mulf %29, %34 : vector<128x128xf32>
      %cst_24 = arith.constant 1.000000e+00 : f32
      %36 = vector.broadcast %cst_24 : f32 to vector<128x128xf32>
      %37 = arith.mulf %36, %33 : vector<128x128xf32>
      %38 = arith.addf %35, %37 : vector<128x128xf32>
      %c0_25 = arith.constant 0 : index
      %c0_26 = arith.constant 0 : index
      %c0_27 = arith.constant 0 : index
      %39 = vector.load %arg9[%c0_25, %c0_26, %c0_27] : memref<1x128x128xf32, #tpu.memory_space<vmem>>, vector<1x128x128xf32>
      %40 = vector.shape_cast %39 : vector<1x128x128xf32> to vector<128x128xf32>
      %41 = vector.shape_cast %38 : vector<128x128xf32> to vector<1x128x128xf32>
      tpu.vector_store %arg9[%c0_25, %c0_26, %c0_27], %41 {strides = array<i32>} : memref<1x128x128xf32, #tpu.memory_space<vmem>>, vector<1x128x128xf32>,
    } else {
    }
    return
  }
  func.func @transform_0(%arg0: i32, %arg1: i32, %arg2: i32) -> (i32, i32, i32) {
    %c0_i32 = arith.constant 0 : i32
    %c0_i32_0 = arith.constant 0 : i32
    return %arg0, %arg1, %c0_i32 : i32, i32, i32
  }
  func.func @transform_1(%arg0: i32, %arg1: i32, %arg2: i32) -> (i32, i32, i32) {
    %c0_i32 = arith.constant 0 : i32
    %c0_i32_0 = arith.constant 0 : i32
    return %arg0, %arg2, %c0_i32 : i32, i32, i32
  }
  func.func @transform_2(%arg0: i32, %arg1: i32, %arg2: i32) -> (i32, i32, i32) {
    %c0_i32 = arith.constant 0 : i32
    %c0_i32_0 = arith.constant 0 : i32
    return %arg0, %arg2, %c0_i32 : i32, i32, i32
  }
  func.func @transform_3(%arg0: i32, %arg1: i32, %arg2: i32) -> (i32, i32) {
    %c0_i32 = arith.constant 0 : i32
    %c0_i32_0 = arith.constant 0 : i32
    %c0_i32_1 = arith.constant 0 : i32
    return %c0_i32, %c0_i32_0 : i32, i32
  }
  func.func @transform_4(%arg0: i32, %arg1: i32, %arg2: i32) -> (i32, i32) {
    %c0_i32 = arith.constant 0 : i32
    %c0_i32_0 = arith.constant 0 : i32
    %c0_i32_1 = arith.constant 0 : i32
    return %c0_i32, %c0_i32_0 : i32, i32
  }
  func.func @transform_5(%arg0: i32, %arg1: i32, %arg2: i32) -> (i32, i32) {
    %c0_i32 = arith.constant 0 : i32
    %c0_i32_0 = arith.constant 0 : i32
    %c0_i32_1 = arith.constant 0 : i32
    return %c0_i32, %c0_i32_0 : i32, i32
  }
  func.func @transform_6(%arg0: i32, %arg1: i32, %arg2: i32) -> (i32, i32, i32) {
    %c0_i32 = arith.constant 0 : i32
    %c0_i32_0 = arith.constant 0 : i32
    return %arg0, %arg1, %c0_i32 : i32, i32, i32
  }
}

</mosaic_0001>

<bundles_post_ra>
// kernel: tpu_custom_call.1
= control target key start
LH: loop header
LB: loop body
LE: loop exit
PB: predicated region body
PF: predicated region fallthrough
CT: control target
= control target key end

     0   :  { %s3548_s0 = inlined_call_operand.hbm [shape: f32[2,256,128], index: 0, kind: input, shape index: {}]   ;;  %s3549_s1 = inlined_call_operand.hbm [shape: bf16[2,256,128], index: 1, kind: input, shape index: {}]   ;;  %s3550_s2 = inlined_call_operand.hbm [shape: bf16[2,256,128], index: 2, kind: input, shape index: {}]   ;;  %s3551_s3 = inlined_call_operand.hbm [shape: bf16[128,128], index: 3, kind: input, shape index: {}]   ;;  %s3552_s4 = inlined_call_operand.vmem [shape: f32[1,128], index: 4, kind: input, shape index: {}]   ;;  %s3553_s5 = inlined_call_operand.vmem [shape: f32[1,128], index: 5, kind: input, shape index: {}]   ;;  %s3554_s6 = inlined_call_operand.hbm [shape: f32[2,256,128], index: 6, kind: output, shape index: {}]  }
   0x1   :  { %3581 = sst [smem:[#allocation35_spill]] %s3548_s0 }
   0x2   :  { %3582 = sst [smem:[#allocation36_spill]] %s3549_s1 }
   0x3   :  { %3583 = sst [smem:[#allocation37_spill]] %s3550_s2 }
   0x4   :  { %3584 = sst [smem:[#allocation38_spill]] %s3551_s3 }
   0x5   :  { %3585 = sst [smem:[#allocation39_spill]] %s3552_s4 }
   0x6   :  { %3586 = sst [smem:[#allocation40_spill]] %s3553_s5 }
   0x7   :  { %3587 = sst [smem:[#allocation41_spill]] %s3554_s6 }
   0x8   :  { %11 = vsyncpa [#allocation7], 0 }
   0x9   :  { %13 = vsyncpa [#allocation7 + $0x1], 0 }
   0xa   :  { %14 = vsyncpa [#allocation10], 0 }
   0xb   :  { %16 = vsyncpa [#allocation10 + $0x1], 0 }
   0xc   :  { %17 = vsyncpa [#allocation13], 0 }
   0xd   :  { %18 = vsyncpa [#allocation8], 0 }
   0xe   :  { %20 = vsyncpa [#allocation8 + $0x1], 0  ;;  %s2801_s21 = smov 0   ;;  %s2803_s22 = smov 0  }
   0xf   :  { %s2805_s23 = smov 0   ;;  %s2807_s24 = smov 0  }
  0x10   :  { %s2809_s25 = smov 0   ;;  %s2811_s26 = smov 0  }
  0x11   :  { %s2813_s27 = smov 0   ;;  %s2815_s28 = smov 0  }
  0x12   :  { %s2817_s29 = smov 0   ;;  %s2819_s30 = smov 0  }
  0x13   :  { %s2821_s7 = smov 0   ;;  %s2823_s8 = smov 0  }
  0x14   :  { %s2825_s9 = smov 0  }
  0x15 LB: > { %3588 = sst [smem:[#allocation19_spill]] %s2705_s22  ;;  %s38_s10 = sadd.s32 1, %s2737_s30  ;;  %s2749_s9 = sphi %s2825_s9, %s26_s9   ;;  %s2745_s8 = sphi %s2823_s8, %s3670_s8   ;;  %s2741_s7 = sphi %s2821_s7, %s3658_s7   ;;  %s2737_s30 = sphi %s2819_s30, %s3669_s30   ;;  %s2733_s29 = sphi %s2817_s29, %s3668_s29   ;;  %s2729_s28 = sphi %s2815_s28, %s3667_s28   ;;  %s2725_s27 = sphi %s2813_s27, %s3666_s27   ;;  %s2721_s26 = sphi %s2811_s26, %s3665_s26   ;;  %s2717_s25 = sphi %s2809_s25, %s3664_s25   ;;  %s2713_s24 = sphi %s2807_s24, %s3655_s24   ;;  %s2709_s23 = sphi %s2805_s23, %s3663_s23   ;;  %s2705_s22 = sphi %s2803_s22, %s3662_s22   ;;  %s2701_s21 = sphi %s2801_s21, %s3661_s21  }
  0x16   : > { %3589 = sst [smem:[#allocation20_spill]] %s2713_s24  ;;  %p2868_p0 = scmp.ge.s32.totalorder %s38_s10, 2 }
  0x17   : > { %3590 = sst [smem:[#allocation21_spill]] %s2717_s25  ;;  %p3559_p1 = scmp.eq.s32.totalorder %s2749_s9, 0 }
  0x18   : > { %3591 = sst [smem:[#allocation22_spill]] %s2725_s27  ;;  %p89_p2 = scmp.ne.s32.totalorder %s2709_s23, %s2705_s22 }
  0x19   : > { %3592 = sst [smem:[#allocation23_spill]] %s2729_s28  ;;  %s3672_s10 = smov (%p2868_p0, %s38_s10), 0 }
  0x1a   : > { %3593 = sst [smem:[#allocation24_spill]] %s2733_s29  ;;  %p2882_p3 = por %p89_p2, %p3559_p1 }
  0x1b   : > { %3594 = sst [smem:[#allocation25_spill]] %s2741_s7  ;;  %p3557_p4 = scmp.lt.s32.totalorder %s2749_s9, 8 }
  0x1c   : > { %s3558_s16 = sshll.u32 %s2745_s8, 5  ;;  %s280_s17 = sand.u32 1, %s2749_s9  }
  0x1d   : > { %s282_s18 = sand.u32 1, %s2709_s23   ;;  %s1920_s20 = sshll.u32 %s2737_s30, 4 }
  0x1e   : > { %s1919_s19 = sshll.u32 %s282_s18, 6  ;;  %s290_s13 = sadd.s32 %s1920_s20, %s3558_s16 }
  0x1f   : > { %s1922_s11 = sshll.u32 %s290_s13, 6  ;;  %s284_s6 = scalar_lea.vmem [#allocation9], %s1919_s19 }
  0x20   : > { %s293_s29 = sshll.u32 %s284_s6, 4  ;;  %s3597_s1 = sld [smem:[#allocation36_spill]]  ;;  %s294_s29 = int_to_ptr.vmem [resolvable:$true] %s293_s29 }
  0x21   : > { %p2902_p5 = pnand %p3557_p4, %p2882_p3  ;;  %s3599_s2 = sld [smem:[#allocation37_spill]] }
  0x22   : > { %s307_s13 = scalar_lea.vmem [#allocation11], %s1919_s19  ;;  %s2913_s5 = scalar_lea.sflag [#allocation10], %s280_s17 }
  0x23   : > { %s316_s6 = sshll.u32 %s307_s13, 4  ;;  %3601 = sst [smem:[#allocation27_spill]] %s2913_s5  ;;  %s2911_s6 = int_to_ptr.vmem [resolvable:$true] %s316_s6 }
  0x24   : > { %p3556_p6 = pneg %p2902_p5  ;;  %s2508_s28 = scalar_lea.vmem %s294_s29, 1024 }
  0x25   : > { %p2509_p7 = scmp.ne.s32.totalorder %s294_s29, %s2508_s28  ;;  %s2751_s14 = smov [#allocation9]  }
  0x26   : > { %s292_s4 = scalar_lea.hbm %s3597_s1, %s1922_s11  ;;  %s2513_s0 = sshll.u32 %s2751_s14, 4  ;;  %s2514_s0 = int_to_ptr.vmem [resolvable:$false] %s2513_s0 }
  0x27   : > { %s2909_s18 = scalar_lea.hbm %s3599_s2, %s1922_s11  ;;  %p2511_p8 = pnand %p2509_p7, %p3556_p6 }
  0x28   : > { %3600 = sst [smem:[#allocation26_spill]] %s2909_s18  ;;  %s2515_s27 = scalar_lea.vmem %s2514_s0, 2048 }
  0x29   : > { %p2512_p9 = pneg %p2511_p8  ;;  %p2516_p10 = scmp.lt.s32.totalorder %s294_s29, %s2514_s0 }
  0x2a   : > { %p2517_p11 = scmp.lt.s32.totalorder %s2515_s27, %s2508_s28 }
  0x2c   : > { %p2518_p12 = por %p2517_p11, %p2516_p10 }
  0x2e   : > { %p2519_p13 = pnand %p2518_p12, %p2512_p9 }
  0x30   : > { %2522 = shalt.err (!%p2519_p13)
}
  0x31   : > { %s3562_s11 = smov 64   ;;  %s3563_s17 = smov 4  }
  0x32   : > { %2236 = dma.hbm_to_vmem [thread:$0]  (!%p2902_p5), %s292_s4, 1024, %s294_s29, %s2913_s5, %s3562_s11, %s3562_s11, %s3563_s17  }
  0x33   : > { %s2927_s19 = sadd.s32 4294967295, %s2749_s9   ;;  %s1911_s20 = sadd.s32 4294967294, %s2749_s9  }
  0x34   : > { %3602 = sst [smem:[#allocation28_spill]] %s2927_s19  ;;  %p67_p2 = scmp.ne.s32.totalorder %s2717_s25, %s2713_s24 }
  0x35   : > { %p3580_p3 = scmp.eq.s32.totalorder %s2927_s19, 0  ;;  %p95_p7 = scmp.ne.s32.totalorder %s2705_s22, %s2701_s21 }
  0x36   : > { %p218_p10 = scmp.eq.s32.totalorder %s1911_s20, 7  ;;  %p1912_p12 = scmp.ge.s32.totalorder %s2749_s9, 1 }
  0x37   : > { %p2938_p9 = por %p3580_p3, %p67_p2  ;;  %p2944_p11 = por %p95_p7, %p3580_p3 }
  0x38   : > { %p2949_p13 = por %p218_p10, %p67_p2  ;;  %p225_p6 = scmp.lt.s32.totalorder %s2749_s9, 9 }
  0x39   : > { %s3603_s13 = scalar_select %p2938_p9, 1, 0 }
  0x3a   : > { %s3605_s4 = scalar_select %p2944_p11, 1, 0 }
  0x3b   : > { %3604 = sst [smem:[#allocation29_spill]] %s3603_s13  ;;  %p2954_p4 = pnand %p1912_p12, %p225_p6 }
  0x3c   : > { %3606 = sst [smem:[#allocation30_spill]] %s3605_s4  ;;  %s2754_s28 = smov [#allocation12]  }
  0x3d   : > { %s3607_s29 = scalar_select %p2949_p13, 1, 0 }
  0x3e   : > { %s3609_s21 = scalar_select %p2954_p4, 1, 0 }
  0x3f   : > { %3608 = sst [smem:[#allocation31_spill]] %s3607_s29  ;;  %s237_s14 = sshll.u32 %s2754_s28, 4  ;;  %s238_s14 = int_to_ptr.vmem [resolvable:$true] %s237_s14 }
  0x40   : > { %3610 = sst [smem:[#allocation32_spill]] %s3609_s21  ;;  %p2226_p8 = pneg %p2954_p4 }
  0x41   : > { %s41_s27 = sadd.s32 1, %s2741_s7  ;;  %s2534_s16 = scalar_lea.vmem %s238_s14, 1024 }
  0x42   : > { %p2962_p7 = pnand %p2226_p8, %p3580_p3  ;;  %s3674_s27 = smov (!%p2868_p0, %s41_s27), %s2741_s7 }
  0x43   : > { %p2535_p2 = scmp.ne.s32.totalorder %s238_s14, %s2534_s16  ;;  %p2542_p1 = scmp.lt.s32.totalorder %s238_s14, %s238_s14 }
  0x44   : > { %p2525_p6 = pneg %p2962_p7  ;;  %p2543_p13 = scmp.lt.s32.totalorder %s2534_s16, %s2534_s16 }
  0x46   : > { %p2537_p10 = pnand %p2535_p2, %p2525_p6  ;;  %p2544_p11 = por %p2543_p13, %p2542_p1 }
  0x48   : > { %p2538_p12 = pneg %p2537_p10 }
  0x4a   : > { %p2545_p9 = pnand %p2544_p11, %p2538_p12 }
  0x4c   : > { %2548 = shalt.err (!%p2545_p9)
}
  0x4d   : > { %s3612_s3 = sld [smem:[#allocation38_spill]]  ;;  %p43_p0 = scmp.ge.s32.totalorder %s3674_s27, 2 }
  0x4e   : > { %p61_p1 = scmp.ne.s32.totalorder %s2721_s26, %s2717_s25  ;;  %s257_s16 = sand.u32 1, %s2721_s26  }
  0x4f   : > { %s1916_s0 = sshll.u32 %s2741_s7, 4  ;;  %s3676_s27 = smov (%p43_p0, %s3674_s27), 0 }
  0x50   : > { %3613 = sst [smem:[#allocation33_spill]] %s3676_s27  ;;  %s3614_s28 = sadd.s32 1, %s2745_s8 }
  0x51   : > { %s3678_s28 = smov (!%p43_p0, %s3614_s28), %s2745_s8  ;;  %s50_s12 = ssub.s32 %s2741_s7, %s3676_s27 }
  0x52   : > { %p3615_p8 = scmp.eq.s32.totalorder %s2749_s9, 0  ;;  %p47_p11 = scmp.ge.s32.totalorder %s3678_s28, 2 }
  0x53   : > { %2229 = dma.hbm_to_vmem [thread:$0]  (!%p2962_p7), %s3612_s3, 1024, %s238_s14, [#allocation13], %s3562_s11, %s3562_s11, %s3563_s17  }
  0x54   : > { %p2994_p9 = por %p3615_p8, %p61_p1  ;;  %p3617_p13 = scmp.eq.s32.totalorder %s2927_s19, 7 }
  0x55   : > { %s1915_s11 = sshll.u32 %s257_s16, 7  ;;  %s3680_s28 = smov (%p47_p11, %s3678_s28), 0 }
  0x56   : > { %p3000_p7 = por %p3617_p13, %p61_p1  ;;  %s3620_s17 = sshll.u32 %s2745_s8, 5 }
  0x57   : > { %s267_s1 = sadd.s32 %s3620_s17, %s1916_s0  ;;  %s49_s2 = ssub.s32 %s2745_s8, %s3680_s28 }
  0x58   : > { %s3618_s14 = scalar_select %p3000_p7, 1, 0 }
  0x59   : > { %s1918_s3 = sshll.u32 %s267_s1, 7  ;;  %s51_s27 = sor.u32 %s50_s12, %s49_s2 }
  0x5a   : > { %3619 = sst [smem:[#allocation34_spill]] %s3618_s14  ;;  %s3621_s7 = ssub.s32 %s2737_s30, %s3672_s10 }
  0x5b   : > { %s79_s29 = sor.u32 %s3621_s7, %s49_s2  ;;  %p52_p6 = scmp.eq.s32.totalorder %s51_s27, 0 }
  0x5c   : > { %p80_p2 = scmp.eq.s32.totalorder %s79_s29, 0  ;;  %s3622_s22 = sld [smem:[#allocation35_spill]] }
  0x5d   : > { %s261_s14 = scalar_lea.vmem [#allocation6], %s1915_s11  ;;  %s3623_s25 = sadd.s32 1, %s2721_s26 }
  0x5e   : > { %s270_s13 = sshll.u32 %s261_s14, 4  ;;  %s3624_s18 = sadd.s32 1, %s2709_s23  ;;  %s271_s13 = int_to_ptr.vmem [resolvable:$true] %s270_s13 }
  0x5f   : > { %s3019_s21 = scalar_select %p52_p6, %s2721_s26, %s3623_s25  }
  0x60   : > { %s3024_s5 = scalar_select %p80_p2, %s2709_s23, %s3624_s18  }
  0x61   : > { %p3625_p10 = scmp.lt.s32.totalorder %s2749_s9, 8  ;;  %s258_s2 = scalar_lea.sflag [#allocation7], %s257_s16 }
  0x62   : > { %s269_s19 = scalar_lea.hbm %s3622_s22, %s1918_s3  ;;  %s2562_s3 = scalar_lea.vmem %s271_s13, 2048 }
  0x63   : > { %p3030_p12 = pnand %p3625_p10, %p2994_p9  ;;  %p2563_p1 = scmp.ne.s32.totalorder %s271_s13, %s2562_s3 }
  0x64   : > { %s2755_s22 = smov [#allocation6]  }
  0x65   : > { %p2551_p0 = pneg %p3030_p12  ;;  %s2567_s24 = sshll.u32 %s2755_s22, 4  ;;  %s2568_s24 = int_to_ptr.vmem [resolvable:$false] %s2567_s24 }
  0x66   : > { %s2569_s25 = scalar_lea.vmem %s2568_s24, 4096  ;;  %p2570_p13 = scmp.lt.s32.totalorder %s271_s13, %s2568_s24 }
  0x67   : > { %p2565_p8 = pnand %p2563_p1, %p2551_p0  ;;  %p2571_p6 = scmp.lt.s32.totalorder %s2569_s25, %s2562_s3 }
  0x69   : > { %p2566_p11 = pneg %p2565_p8  ;;  %p2572_p2 = por %p2571_p6, %p2570_p13 }
  0x6b   : > { %p2573_p3 = pnand %p2572_p2, %p2566_p11 }
  0x6d   : > { %2576 = shalt.err (!%p2573_p3)
}
  0x6e   : > { %s2756_s7 = smov 128   ;;  %s2757_s18 = smov 8  }
  0x6f   : > { %2233 = dma.hbm_to_vmem [thread:$0]  (!%p3030_p12), %s269_s19, 2048, %s271_s13, %s258_s2, %s2756_s7, %s2756_s7, %s2757_s18  }
  0x70   : > { %s2590_s11 = scalar_lea.vmem %s2911_s6, 1024  ;;  %p3627_p10 = pneg %p2902_p5 }
  0x71   : > { %p2591_p9 = scmp.ne.s32.totalorder %s2911_s6, %s2590_s11  ;;  %s2758_s17 = smov [#allocation11]  }
  0x72   : > { %s2595_s4 = sshll.u32 %s2758_s17, 4  ;;  %s2596_s4 = int_to_ptr.vmem [resolvable:$false] %s2595_s4 }
  0x73   : > { %p2593_p0 = pnand %p2591_p9, %p3627_p10  ;;  %s2597_s29 = scalar_lea.vmem %s2596_s4, 2048 }
  0x74   : > { %p2598_p3 = scmp.lt.s32.totalorder %s2911_s6, %s2596_s4  ;;  %p2599_p8 = scmp.lt.s32.totalorder %s2597_s29, %s2590_s11 }
  0x75   : > { %p2594_p1 = pneg %p2593_p0 }
  0x76   : > { %p2600_p11 = por %p2599_p8, %p2598_p3 }
  0x78   : > { %p2601_p13 = pnand %p2600_p11, %p2594_p1 }
  0x7a   : > { %2604 = shalt.err (!%p2601_p13)
}
  0x7b   : > { %s3628_s27 = smov 4   ;;  %s3629_s20 = smov 64  }
  0x7c   : > { %s3630_s19 = sld [smem:[#allocation27_spill]] }
  0x7d   : > { %s3631_s13 = sld [smem:[#allocation26_spill]] }
  0x7e   : > { %s3633_s0 = sld [smem:[#allocation21_spill]] (!%p2954_p4) }
  0x7f   : > { %328 = sbr.rel (%p2954_p4) target bundleno = 1399 (0x577), region = 44  ;;  %s3634_s12 = sld [smem:[#allocation29_spill]] (!%p2954_p4) }
  0x83   : > { %2239 = dma.hbm_to_vmem [thread:$0]  (!%p2902_p5), %s3631_s13, 1024, %s2911_s6, %s3630_s19, %s3629_s20, %s3629_s20, %s3628_s27  }
  0x84   : > { %s3055_s14 = sand.u32 1, %s3633_s0  }
  0x85   : > { %s1928_s1 = sshll.u32 %s3055_s14, 7  ;;  %s331_s2 = scalar_lea.sflag [#allocation7], %s3055_s14 }
  0x86   : > { %s3059_s3 = scalar_lea.vmem [#allocation6], %s1928_s1  ;;  %p3635_p12 = scmp.ne.s32.totalorder %s3634_s12, 0 }
  0x88   : > { %2684 = dma.done.wait (%p3635_p12), %s331_s2, 2048  }
  0x89   : > { %2686 = vsyncadd (%p3635_p12), %s331_s2, 4294965248  ;;  %s3636_s15 = sld [smem:[#allocation28_spill]] }
  0x8a   : > { %s3637_s6 = sld [smem:[#allocation19_spill]] }
  0x8b   : > { %s3638_s22 = sld [smem:[#allocation30_spill]] }
  0x8f   : > { %s339_s24 = sand.u32 1, %s3636_s15  }
  0x90   : > { %s341_s25 = sand.u32 1, %s3637_s6   ;;  %s340_s18 = scalar_lea.sflag [#allocation10], %s339_s24 }
  0x91   : > { %s1929_s7 = sshll.u32 %s341_s25, 6  ;;  %p3639_p4 = scmp.ne.s32.totalorder %s3638_s22, 0 }
  0x92   : > { %s3067_s11 = scalar_lea.vmem [#allocation9], %s1929_s7 }
  0x93   : > { %2688 = dma.done.wait (%p3639_p4), %s340_s18, 2048  }
  0x94   : > { %2690 = vsyncadd (%p3639_p4), %s340_s18, 4294965248  ;;  %s3073_s17 = scalar_lea.vmem [#allocation11], %s1929_s7  ;;  %p3640_p5 = scmp.eq.s32.totalorder %s3636_s15, 0 }
  0x96   : > { %2692 = dma.done.wait (%p3640_p5), [#allocation13], 1024   ;;  %p3641_p6 = pmov %p3640_p5 }
  0x97   : > { %s3079_s4 = scalar_lea.vmem [#allocation14], %s1928_s1  ;;  %s3642_s29 = sld [smem:[#allocation22_spill]] }
  0x98   : > { %2694 = vsyncadd (%p3641_p6), [#allocation13], 4294966272 }
  0x9d   : > { %p1933_p2 = scmp.ne.s32.totalorder %s3642_s29, 0 }
  0x9e   : > { %s3643_s19 = sld [smem:[#allocation39_spill]] (!%p1933_p2) }
  0x9f   : > { %403 = sbr.rel (%p1933_p2) target bundleno = 413 (0x19d), region = 64  ;;  %s3644_s0 = sld [smem:[#allocation40_spill]] (!%p1933_p2) }
  0xa4   : > { %v2363_v0 = vld [vmem:[#allocation12 + $0x38] sm:$0xff]   ;;  %v2364_v1 = vld [vmem:[#allocation12 + $0x30] sm:$0xff]   ;;  %v2365_v2 = vld [vmem:[#allocation12 + $0x28] sm:$0xff]   ;;  %vm731_vm0 = vcmask 7168   ;;  %v2759_v32 = vmov -inf   ;;  %v2760_v33 = vmov 0.0  }
  0xa5   : > { %2102 = vmatprep.subr.bf16.mxu0 %v2363_v0  ;;  %2198 = vmatprep.subr.bf16.mxu1 %v2363_v0  ;;  %v2366_v3 = vld [vmem:[#allocation12 + $0x20] sm:$0xff]   ;;  %v405_v5 = vld [vmem:[%s3059_s3 + $0x8] sm:$0xff]  ;;  %v2367_v10 = vld [vmem:[#allocation12 + $0x18] sm:$0xff]   ;;  %732 = vst.msk [vmem:[#allocation3] sm:$0xff] %vm731_vm0, %v2759_v32 }
  0xa6   : > { %2103 = vmatpush3.bf16.msra.mxu0 %v2363_v0  ;;  %2206 = vmatpush3.bf16.msra.mxu1 %v2363_v0  ;;  %v404_v4 = vld [vmem:[%s3059_s3] sm:$0xff]  ;;  %v413_v8 = vld [vmem:[%s3059_s3 + $0x48] sm:$0xff]  ;;  %v2368_v11 = vld [vmem:[#allocation12 + $0x10] sm:$0xff]   ;;  %733 = vst.msk [vmem:[#allocation3 + $0x8] sm:$0xff] %vm731_vm0, %v2759_v32 }
  0xa7   : > { %2104 = vmatprep.subr.bf16.mxu0 %v2364_v1  ;;  %2199 = vmatprep.subr.bf16.mxu1 %v2364_v1  ;;  %v412_v6 = vld [vmem:[%s3059_s3 + $0x40] sm:$0xff]  ;;  %v420_v7 = vpack.c.bf16 %v405_v5, %v404_v4  ;;  %v2369_v12 = vld [vmem:[#allocation12 + $0x8] sm:$0xff]   ;;  %v406_v14 = vld [vmem:[%s3059_s3 + $0x10] sm:$0xff]  ;;  %734 = vst.msk [vmem:[#allocation3 + $0x10] sm:$0xff] %vm731_vm0, %v2759_v32 }
  0xa8   : > { %v424_v9 = vpack.c.bf16 %v413_v8, %v412_v6  ;;  %v2370_v13 = vld [vmem:[#allocation12] sm:$0xff]   ;;  %v407_v15 = vld [vmem:[%s3059_s3 + $0x18] sm:$0xff]  ;;  %v414_v16 = vld [vmem:[%s3059_s3 + $0x50] sm:$0xff]  ;;  %735 = vst.msk [vmem:[#allocation3 + $0x18] sm:$0xff] %vm731_vm0, %v2759_v32 }
  0xa9   : > { %2118 = vmatprep.mubr.bf16.mxu0 %v420_v7  ;;  %v415_v17 = vld [vmem:[%s3059_s3 + $0x58] sm:$0xff]  ;;  %v408_v18 = vld [vmem:[%s3059_s3 + $0x20] sm:$0xff]  ;;  %v409_v19 = vld [vmem:[%s3059_s3 + $0x28] sm:$0xff]  ;;  %v421_v22 = vpack.c.bf16 %v407_v15, %v406_v14  ;;  %736 = vst.msk [vmem:[#allocation3 + $0x20] sm:$0xff] %vm731_vm0, %v2759_v32 }
  0xaa   : > { %2105 = vmatpush3.bf16.msra.mxu0 %v2364_v1  ;;  %2207 = vmatpush3.bf16.msra.mxu1 %v2364_v1  ;;  %v416_v20 = vld [vmem:[%s3059_s3 + $0x60] sm:$0xff]  ;;  %v417_v21 = vld [vmem:[%s3059_s3 + $0x68] sm:$0xff]  ;;  %v425_v23 = vpack.c.bf16 %v415_v17, %v414_v16  ;;  %v422_v24 = vpack.c.bf16 %v409_v19, %v408_v18  ;;  %v410_v26 = vld [vmem:[%s3059_s3 + $0x30] sm:$0xff]  ;;  %737 = vst.msk [vmem:[#allocation3 + $0x28] sm:$0xff] %vm731_vm0, %v2759_v32 }
  0xab   : > { %2106 = vmatprep.subr.bf16.mxu0 %v2365_v2  ;;  %2200 = vmatprep.subr.bf16.mxu1 %v2365_v2  ;;  %v426_v25 = vpack.c.bf16 %v417_v21, %v416_v20  ;;  %v411_v27 = vld [vmem:[%s3059_s3 + $0x38] sm:$0xff]  ;;  %v418_v28 = vld [vmem:[%s3059_s3 + $0x70] sm:$0xff]  ;;  %738 = vst.msk [vmem:[#allocation3 + $0x30] sm:$0xff] %vm731_vm0, %v2759_v32  ;;  %739 = vst.msk [vmem:[#allocation3 + $0x38] sm:$0xff] %vm731_vm0, %v2759_v32 }
  0xac   : > { %2126 = vmatprep.mubr.bf16.mxu1 %v424_v9  ;;  %v419_v29 = vld [vmem:[%s3059_s3 + $0x78] sm:$0xff]  ;;  %v423_v30 = vpack.c.bf16 %v411_v27, %v410_v26  ;;  %740 = vst.msk [vmem:[#allocation3 + $0x40] sm:$0xff] %vm731_vm0, %v2759_v32  ;;  %741 = vst.msk [vmem:[#allocation3 + $0x48] sm:$0xff] %vm731_vm0, %v2759_v32  ;;  %v3117_v34 = vld [vmem:[%s3643_s19] ss:$0 sm:$0xff] }
  0xad   : > { %v427_v31 = vpack.c.bf16 %v419_v29, %v418_v28  ;;  %742 = vst.msk [vmem:[#allocation3 + $0x50] sm:$0xff] %vm731_vm0, %v2759_v32  ;;  %743 = vst.msk [vmem:[#allocation3 + $0x58] sm:$0xff] %vm731_vm0, %v2759_v32  ;;  %v3122_v36 = vld [vmem:[%s3644_s0] ss:$0 sm:$0xff] }
  0xae   : > { %2107 = vmatpush3.bf16.msra.mxu0 %v2365_v2  ;;  %2208 = vmatpush3.bf16.msra.mxu1 %v2365_v2  ;;  %744 = vst.msk [vmem:[#allocation3 + $0x60] sm:$0xff] %vm731_vm0, %v2759_v32  ;;  %745 = vst.msk [vmem:[#allocation3 + $0x68] sm:$0xff] %vm731_vm0, %v2759_v32 }
  0xaf   : > { %2108 = vmatprep.subr.bf16.mxu0 %v2366_v3  ;;  %2201 = vmatprep.subr.bf16.mxu1 %v2366_v3  ;;  %746 = vst.msk [vmem:[#allocation3 + $0x70] sm:$0xff] %vm731_vm0, %v2759_v32  ;;  %747 = vst.msk [vmem:[#allocation3 + $0x78] sm:$0xff] %vm731_vm0, %v2759_v32 }
  0xb0   : > { %748 = vst [vmem:[#allocation5 + $0x30] sm:$0xff] %v2760_v33  ;;  %749 = vst [vmem:[#allocation5] sm:$0xff] %v2760_v33 }
  0xb1   : > { %750 = vst [vmem:[#allocation5 + $0x58] sm:$0xff] %v2760_v33  ;;  %751 = vst [vmem:[#allocation5 + $0x18] sm:$0xff] %v2760_v33 }
  0xb2   : > { %2109 = vmatpush3.bf16.msra.mxu0 %v2366_v3  ;;  %2209 = vmatpush3.bf16.msra.mxu1 %v2366_v3  ;;  %752 = vst [vmem:[#allocation5 + $0x50] sm:$0xff] %v2760_v33  ;;  %753 = vst [vmem:[#allocation5 + $0x68] sm:$0xff] %v2760_v33 }
  0xb3   : > { %2110 = vmatprep.subr.bf16.mxu0 %v2367_v10  ;;  %2202 = vmatprep.subr.bf16.mxu1 %v2367_v10  ;;  %754 = vst [vmem:[#allocation5 + $0x8] sm:$0xff] %v2760_v33  ;;  %755 = vst [vmem:[#allocation5 + $0x48] sm:$0xff] %v2760_v33 }
  0xb4   : > { %756 = vst [vmem:[#allocation5 + $0x40] sm:$0xff] %v2760_v33  ;;  %757 = vst [vmem:[#allocation5 + $0x20] sm:$0xff] %v2760_v33 }
  0xb5   : > { %758 = vst [vmem:[#allocation5 + $0x10] sm:$0xff] %v2760_v33  ;;  %759 = vst [vmem:[#allocation5 + $0x38] sm:$0xff] %v2760_v33 }
  0xb6   : > { %2111 = vmatpush3.bf16.msra.mxu0 %v2367_v10  ;;  %2210 = vmatpush3.bf16.msra.mxu1 %v2367_v10  ;;  %760 = vst [vmem:[#allocation5 + $0x60] sm:$0xff] %v2760_v33  ;;  %761 = vst [vmem:[#allocation5 + $0x70] sm:$0xff] %v2760_v33 }
  0xb7   : > { %2112 = vmatprep.subr.bf16.mxu0 %v2368_v11  ;;  %2203 = vmatprep.subr.bf16.mxu1 %v2368_v11  ;;  %762 = vst [vmem:[#allocation5 + $0x78] sm:$0xff] %v2760_v33  ;;  %763 = vst [vmem:[#allocation5 + $0x28] sm:$0xff] %v2760_v33 }
  0xba   : > { %2113 = vmatpush3.bf16.msra.mxu0 %v2368_v11  ;;  %2211 = vmatpush3.bf16.msra.mxu1 %v2368_v11 }
  0xbb   : > { %2114 = vmatprep.subr.bf16.mxu0 %v2369_v12  ;;  %2204 = vmatprep.subr.bf16.mxu1 %v2369_v12 }
  0xbe   : > { %2115 = vmatpush3.bf16.msra.mxu0 %v2369_v12  ;;  %2212 = vmatpush3.bf16.msra.mxu1 %v2369_v12 }
  0xbf   : > { %2116 = vmatprep.subr.bf16.mxu0 %v2370_v13  ;;  %2205 = vmatprep.subr.bf16.mxu1 %v2370_v13 }
  0xc2   : > { %2117 = vmatpush3.bf16.msra.mxu0 %v2370_v13  ;;  %2213 = vmatpush3.bf16.msra.mxu1 %v2370_v13 }
  0xc5   : > { %2119 = vmatmul.mubr.bf16.vlgmr.msra.gmra.mxu0 %v421_v22  ;;  %2127 = vmatmul.mubr.bf16.vlgmr.msra.gmra.mxu1 %v425_v23 }
  0xc6   : > { %2122 = vmatprep.mubr.bf16.mxu0 %v422_v24  ;;  %2130 = vmatprep.mubr.bf16.mxu1 %v426_v25 }
  0xcd   : > { %2123 = vmatmul.mubr.bf16.gmra.mxu0 %v423_v30  ;;  %2131 = vmatmul.mubr.bf16.gmra.mxu1 %v427_v31 }
 0x185   : > { %v2120_v35 = vpop.f32.mrf.mxu0  ;;  %v2128_v37 = vpop.f32.mrf.mxu1 }
 0x186   : > { %v542_v38 = vadd.f32 %v2120_v35, %v3117_v34  ;;  %v574_v39 = vadd.f32 %v2128_v37, %v3117_v34 }
 0x187   : > { %v533_v40 = vpop.f32.mrf.mxu0  ;;  %v565_v41 = vpop.f32.mrf.mxu1 }
 0x188   : > { %vm598_vm1 = vcmp.ge.f32.partialorder %v542_v38, 0.0  ;;  %v621_v42 = vmul.f32 %v3122_v36, %v542_v38  ;;  %vm606_vm2 = vcmp.ge.f32.partialorder %v574_v39, 0.0  ;;  %v629_v43 = vmul.f32 %v3122_v36, %v574_v39 }
 0x189   : > { %v534_v44 = vadd.f32 %v3117_v34, %v533_v40  ;;  %v566_v45 = vadd.f32 %v3117_v34, %v565_v41  ;;  %v2121_v46 = vpop.f32.mrf.mxu0  ;;  %v2129_v47 = vpop.f32.mrf.mxu1 }
 0x18a   : > { %v545_v48 = vadd.f32 %v2121_v46, %v3117_v34  ;;  %v577_v49 = vadd.f32 %v2129_v47, %v3117_v34  ;;  %v637_v50 = vsel %vm598_vm1, %v542_v38, %v621_v42  ;;  %v645_v51 = vsel %vm606_vm2, %v574_v39, %v629_v43 }
 0x18b   : > { %vm596_vm3 = vcmp.ge.f32.partialorder %v534_v44, 0.0  ;;  %v619_v52 = vmul.f32 %v3122_v36, %v534_v44  ;;  %v536_v53 = vpop.f32.mrf.mxu0  ;;  %v568_v54 = vpop.f32.mrf.mxu1  ;;  %vm604_vm6 = vcmp.ge.f32.partialorder %v566_v45, 0.0  ;;  %v627_v57 = vmul.f32 %v3122_v36, %v566_v45 }
 0x18c   : > { %vm599_vm4 = vcmp.ge.f32.partialorder %v545_v48, 0.0  ;;  %v622_v55 = vmul.f32 %v3122_v36, %v545_v48  ;;  %vm607_vm5 = vcmp.ge.f32.partialorder %v577_v49, 0.0  ;;  %v630_v56 = vmul.f32 %v3122_v36, %v577_v49 }
 0x18d   : > { %v537_v58 = vadd.f32 %v3117_v34, %v536_v53  ;;  %v569_v59 = vadd.f32 %v3117_v34, %v568_v54  ;;  %v2124_v60 = vpop.f32.mrf.mxu0  ;;  %v2132_v61 = vpop.f32.mrf.mxu1  ;;  %v635_v8 = vsel %vm596_vm3, %v534_v44, %v619_v52  ;;  %v643_v13 = vsel %vm604_vm6, %v566_v45, %v627_v57 }
 0x18e   : > { %v638_v62 = vsel %vm599_vm4, %v545_v48, %v622_v55  ;;  %v646_v63 = vsel %vm607_vm5, %v577_v49, %v630_v56  ;;  %v558_v0 = vadd.f32 %v2124_v60, %v3117_v34  ;;  %v590_v1 = vadd.f32 %v2132_v61, %v3117_v34 }
 0x18f   : > { %v2015_v2 = vpack.c.bf16 %v638_v62, %v637_v50  ;;  %v2035_v3 = vpack.c.bf16 %v646_v63, %v645_v51  ;;  %vm597_vm7 = vcmp.ge.f32.partialorder %v537_v58, 0.0  ;;  %v620_v4 = vmul.f32 %v3122_v36, %v537_v58  ;;  %v549_v5 = vpop.f32.mrf.mxu0  ;;  %v581_v6 = vpop.f32.mrf.mxu1 }
 0x190   : > { %vm605_vm8 = vcmp.ge.f32.partialorder %v569_v59, 0.0  ;;  %v628_v7 = vmul.f32 %v3122_v36, %v569_v59  ;;  %v550_v10 = vadd.f32 %v3117_v34, %v549_v5  ;;  %v582_v16 = vadd.f32 %v3117_v34, %v581_v6 }
 0x191   : > { %2047 = vst [vmem:[#allocation2 + $0x8] sm:$0xff] %v2015_v2   ;;  %2051 = vst [vmem:[#allocation2 + $0x28] sm:$0xff] %v2035_v3   ;;  %v636_v9 = vsel %vm597_vm7, %v537_v58, %v620_v4  ;;  %v2125_v11 = vpop.f32.mrf.mxu0  ;;  %v2133_v12 = vpop.f32.mrf.mxu1  ;;  %vm602_vm9 = vcmp.ge.f32.partialorder %v558_v0, 0.0  ;;  %v625_v18 = vmul.f32 %v3122_v36, %v558_v0  ;;  %vm610_vm10 = vcmp.ge.f32.partialorder %v590_v1, 0.0 }
 0x192   : > { %v2010_v14 = vpack.c.bf16 %v636_v9, %v635_v8  ;;  %v644_v15 = vsel %vm605_vm8, %v569_v59, %v628_v7  ;;  %v633_v21 = vmul.f32 %v3122_v36, %v590_v1  ;;  %vm600_vm11 = vcmp.ge.f32.partialorder %v550_v10, 0.0 }
 0x193   : > { %v2030_v17 = vpack.c.bf16 %v644_v15, %v643_v13  ;;  %v552_v19 = vpop.f32.mrf.mxu0  ;;  %v584_v20 = vpop.f32.mrf.mxu1  ;;  %v561_v22 = vadd.f32 %v2125_v11, %v3117_v34  ;;  %v593_v23 = vadd.f32 %v2133_v12, %v3117_v34  ;;  %v623_v24 = vmul.f32 %v3122_v36, %v550_v10 }
 0x194   : > { %2011 = vst [vmem:[#allocation2] sm:$0xff] %v2010_v14   ;;  %vm608_vm12 = vcmp.ge.f32.partialorder %v582_v16, 0.0  ;;  %v553_v25 = vadd.f32 %v3117_v34, %v552_v19  ;;  %v585_v26 = vadd.f32 %v3117_v34, %v584_v20  ;;  %v631_v27 = vmul.f32 %v3122_v36, %v582_v16 }
 0x195   : > { %2050 = vst [vmem:[#allocation2 + $0x20] sm:$0xff] %v2030_v17   ;;  %vm603_vm13 = vcmp.ge.f32.partialorder %v561_v22, 0.0  ;;  %v626_v28 = vmul.f32 %v3122_v36, %v561_v22  ;;  %vm611_vm14 = vcmp.ge.f32.partialorder %v593_v23, 0.0  ;;  %v634_v29 = vmul.f32 %v3122_v36, %v593_v23 }
 0x196   : > { %vm601_vm15 = vcmp.ge.f32.partialorder %v553_v25, 0.0  ;;  %v624_v30 = vmul.f32 %v3122_v36, %v553_v25  ;;  %vm609_vm0 = vcmp.ge.f32.partialorder %v585_v26, 0.0  ;;  %v641_v31 = vsel %vm602_vm9, %v558_v0, %v625_v18 }
 0x197   : > { %v649_v32 = vsel %vm610_vm10, %v590_v1, %v633_v21  ;;  %v642_v33 = vsel %vm603_vm13, %v561_v22, %v626_v28  ;;  %v632_v35 = vmul.f32 %v3122_v36, %v585_v26  ;;  %v639_v34 = vsel %vm600_vm11, %v550_v10, %v623_v24 }
 0x198   : > { %v2025_v37 = vpack.c.bf16 %v642_v33, %v641_v31  ;;  %v650_v38 = vsel %vm611_vm14, %v593_v23, %v634_v29  ;;  %v640_v39 = vsel %vm601_vm15, %v553_v25, %v624_v30  ;;  %v647_v40 = vsel %vm608_vm12, %v582_v16, %v631_v27 }
 0x199   : > { %v2045_v41 = vpack.c.bf16 %v650_v38, %v649_v32  ;;  %v2020_v42 = vpack.c.bf16 %v640_v39, %v639_v34  ;;  %v648_v43 = vsel %vm609_vm0, %v585_v26, %v632_v35 }
 0x19a   : > { %2049 = vst [vmem:[#allocation2 + $0x18] sm:$0xff] %v2025_v37   ;;  %v2040_v44 = vpack.c.bf16 %v648_v43, %v647_v40 }
 0x19b   : > { %2053 = vst [vmem:[#allocation2 + $0x38] sm:$0xff] %v2045_v41   ;;  %2048 = vst [vmem:[#allocation2 + $0x10] sm:$0xff] %v2020_v42  }
 0x19c   : > { %2052 = vst [vmem:[#allocation2 + $0x30] sm:$0xff] %v2040_v44  }
 0x19d PF: > { %v2373_v36 = vld [vmem:[%s3067_s11 + $0x38] sm:$0xff]   ;;  %v2374_v45 = vld [vmem:[%s3067_s11 + $0x30] sm:$0xff]   ;;  %v2375_v46 = vld [vmem:[%s3067_s11 + $0x28] sm:$0xff]   ;;  %v2761_v3 = vmov 0   ;;  %vm1542_vm1 = vcmask 7168   ;;  %s3645_s12 = sld [smem:[#allocation22_spill]] }
 0x19e   : > { %2134 = vmatprep.subr.bf16.mxu0 %v2373_v36  ;;  %v2381_v47 = vld [vmem:[#allocation2] sm:$0xff]   ;;  %v2377_v49 = vld [vmem:[%s3067_s11 + $0x18] sm:$0xff]   ;;  %v2378_v50 = vld [vmem:[%s3067_s11 + $0x10] sm:$0xff]   ;;  %2372 = vset.pattern.permute.xlu1 %v2761_v3 }
 0x19f   : > { %2135 = vmatpush3.bf16.xpose.msra.mxu0 %v2373_v36  ;;  %2150 = vmatprep.mubr.bf16.mxu0 %v2381_v47  ;;  %v2376_v48 = vld [vmem:[%s3067_s11 + $0x20] sm:$0xff]   ;;  %v2379_v51 = vld [vmem:[%s3067_s11 + $0x8] sm:$0xff]   ;;  %v2389_v13 = vld [vmem:[%s3073_s17 + $0x38] sm:$0xff]  }
 0x1a0   : > { %2136 = vmatprep.subr.bf16.mxu0 %v2374_v45  ;;  %v2380_v52 = vld [vmem:[%s3067_s11] sm:$0xff]   ;;  %v2382_v53 = vld [vmem:[#allocation2 + $0x8] sm:$0xff]   ;;  %2371 = vset.pattern.permute.xlu0 %v2761_v3  ;;  %v3219_v14 = vld [vmem:[#allocation3 + $0x10] sm:$0xff] }
 0x1a1   : > { %v2384_v55 = vld [vmem:[#allocation2 + $0x18] sm:$0xff]   ;;  %v2385_v56 = vld [vmem:[#allocation2 + $0x20] sm:$0xff]   ;;  %v2386_v57 = vld [vmem:[#allocation2 + $0x28] sm:$0xff]   ;;  %2166 = vmatprep.subr.bf16.mxu1 %v2389_v13 }
 0x1a2   : > { %v2383_v54 = vld [vmem:[#allocation2 + $0x10] sm:$0xff]   ;;  %v2388_v59 = vld [vmem:[#allocation2 + $0x38] sm:$0xff]   ;;  %2167 = vmatpush3.bf16.msra.mxu1 %v2389_v13  ;;  %v3222_v17 = vld [vmem:[#allocation3] sm:$0xff] }
 0x1a3   : > { %v2387_v58 = vld [vmem:[#allocation2 + $0x30] sm:$0xff]   ;;  %v3227_v20 = vld [vmem:[#allocation3 + $0x18] sm:$0xff]  ;;  %v2391_v21 = vld [vmem:[%s3073_s17 + $0x28] sm:$0xff]   ;;  %p1984_p9 = scmp.ne.s32.totalorder %s3645_s12, 1 }
 0x1a4   : > { %v2390_v15 = vld [vmem:[%s3073_s17 + $0x30] sm:$0xff]   ;;  %v990_v24 = vld [vmem:[#allocation3 + $0x8] sm:$0xff]  ;;  %v2392_v27 = vld [vmem:[%s3073_s17 + $0x20] sm:$0xff]  }
 0x1a5   : > { %2168 = vmatprep.subr.bf16.mxu1 %v2390_v15  ;;  %v3246_v29 = vld [vmem:[#allocation3 + $0x20] sm:$0xff]  ;;  %v3249_v31 = vld [vmem:[#allocation3 + $0x38] sm:$0xff]  ;;  %v3255_v34 = vld [vmem:[#allocation3 + $0x30] sm:$0xff] }
 0x1a6   : > { %2169 = vmatpush3.bf16.msra.mxu1 %v2390_v15  ;;  %v2393_v32 = vld [vmem:[%s3073_s17 + $0x18] sm:$0xff]   ;;  %v3262_v39 = vld [vmem:[#allocation3 + $0x28] sm:$0xff]  ;;  %v2394_v40 = vld [vmem:[%s3073_s17 + $0x10] sm:$0xff]  }
 0x1a7   : > { %2137 = vmatpush3.bf16.xpose.msra.mxu0 %v2374_v45  ;;  %2170 = vmatprep.subr.bf16.mxu1 %v2391_v21  ;;  %v3270_v43 = vld [vmem:[#allocation3 + $0x40] sm:$0xff]  ;;  %v3278_v45 = vld [vmem:[#allocation3 + $0x58] sm:$0xff] }
 0x1a8   : > { %2138 = vmatprep.subr.bf16.mxu0 %v2375_v46  ;;  %v3307_v15 = vld [vmem:[#allocation3 + $0x78] sm:$0xff] }
 0x1aa   : > { %2171 = vmatpush3.bf16.msra.mxu1 %v2391_v21  ;;  %v3315_v21 = vld [vmem:[#allocation3 + $0x70] sm:$0xff] }
 0x1ab   : > { %2172 = vmatprep.subr.bf16.mxu1 %v2392_v27 }
 0x1ae   : > { %2173 = vmatpush3.bf16.msra.mxu1 %v2392_v27 }
 0x1af   : > { %2139 = vmatpush3.bf16.xpose.msra.mxu0 %v2375_v46  ;;  %2174 = vmatprep.subr.bf16.mxu1 %v2393_v32  ;;  %v2395_v46 = vld [vmem:[%s3073_s17 + $0x8] sm:$0xff]  }
 0x1b0   : > { %2140 = vmatprep.subr.bf16.mxu0 %v2376_v48 }
 0x1b2   : > { %2175 = vmatpush3.bf16.msra.mxu1 %v2393_v32 }
 0x1b3   : > { %2176 = vmatprep.subr.bf16.mxu1 %v2394_v40 }
 0x1b6   : > { %2177 = vmatpush3.bf16.msra.mxu1 %v2394_v40 }
 0x1b7   : > { %2141 = vmatpush3.bf16.xpose.msra.mxu0 %v2376_v48  ;;  %2178 = vmatprep.subr.bf16.mxu1 %v2395_v46 }
 0x1b8   : > { %2142 = vmatprep.subr.bf16.mxu0 %v2377_v49 }
 0x1ba   : > { %2179 = vmatpush3.bf16.msra.mxu1 %v2395_v46 }
 0x1bf   : > { %2143 = vmatpush3.bf16.xpose.msra.mxu0 %v2377_v49  ;;  %v3286_v49 = vld [vmem:[#allocation3 + $0x50] sm:$0xff] }
 0x1c0   : > { %2144 = vmatprep.subr.bf16.mxu0 %v2378_v50 }
 0x1c7   : > { %2145 = vmatpush3.bf16.xpose.msra.mxu0 %v2378_v50 }
 0x1c8   : > { %2146 = vmatprep.subr.bf16.mxu0 %v2379_v51 }
 0x1cf   : > { %2147 = vmatpush3.bf16.xpose.msra.mxu0 %v2379_v51 }
 0x1d0   : > { %2148 = vmatprep.subr.bf16.mxu0 %v2380_v52 }
 0x1d7   : > { %2149 = vmatpush3.bf16.xpose.msra.mxu0 %v2380_v52 }
 0x1de   : > { %2151 = vmatmul.mubr.bf16.vlgmr.msra.gmra.mxu0 %v2382_v53  ;;  %v3292_v53 = vld [vmem:[#allocation3 + $0x48] sm:$0xff] }
 0x1df   : > { %2154 = vmatprep.mubr.bf16.mxu0 %v2383_v54  ;;  %v2396_v54 = vld [vmem:[%s3073_s17] sm:$0xff]  }
 0x1e0   : > { %2180 = vmatprep.subr.bf16.mxu1 %v2396_v54 }
 0x1e1   : > { %2181 = vmatpush3.bf16.msra.mxu1 %v2396_v54 }
 0x1e6   : > { %2155 = vmatmul.mubr.bf16.gmra.mxu0 %v2384_v55 }
 0x1e7   : > { %2158 = vmatprep.mubr.bf16.mxu0 %v2385_v56 }
 0x1ee   : > { %2159 = vmatmul.mubr.bf16.gmra.mxu0 %v2386_v57  ;;  %v3299_v57 = vld [vmem:[#allocation3 + $0x60] sm:$0xff] }
 0x1ef   : > { %2162 = vmatprep.mubr.bf16.mxu0 %v2387_v58 }
 0x1f6   : > { %2163 = vmatmul.mubr.bf16.gmra.mxu0 %v2388_v59 }
 0x29e   : > { %v3170_v60 = vpop.f32.mrf.mxu0 }
 0x29f   : > { %1009 = vmax.xlane.f32.xlu1 %v3170_v60 }
 0x2a0   : > { %v3173_v61 = vpop.f32.mrf.mxu0 }
 0x2a1   : > { %1005 = vmax.xlane.f32.xlu0 %v3173_v61 }
 0x2a2   : > { %v3176_v62 = vpop.f32.mrf.mxu0 }
 0x2a3   : > { %1011 = vmax.xlane.f32.xlu1 %v3176_v62 }
 0x2a4   : > { %v3179_v63 = vpop.f32.mrf.mxu0 }
 0x2a5   : > { %1007 = vmax.xlane.f32.xlu0 %v3179_v63 }
 0x2a6   : > { %v3182_v0 = vpop.f32.mrf.mxu0 }
 0x2a8   : > { %v3184_v1 = vpop.f32.mrf.mxu0 }
 0x2a9   : > { %1013 = vmax.xlane.f32.xlu0 %v3184_v1 }
 0x2aa   : > { %v3187_v2 = vpop.f32.mrf.mxu0 }
 0x2ab   : > { %1019 = vmax.xlane.f32.xlu1 %v3187_v2 }
 0x2ac   : > { %v3190_v4 = vpop.f32.mrf.mxu0 }
 0x2ad   : > { %1017 = vmax.xlane.f32.xlu0 %v3182_v0 }
 0x2ae   : > { %v3193_v5 = vpop.f32.mrf.mxu0 }
 0x2af   : > { %1015 = vmax.xlane.f32.xlu1 %v3190_v4 }
 0x2b0   : > { %v3196_v6 = vpop.f32.mrf.mxu0 }
 0x2b1   : > { %1021 = vmax.xlane.f32.xlu0 %v3196_v6 }
 0x2b2   : > { %v3199_v7 = vpop.f32.mrf.mxu0 }
 0x2b3   : > { %1027 = vmax.xlane.f32.xlu1 %v3199_v7 }
 0x2b4   : > { %v3202_v8 = vpop.f32.mrf.mxu0 }
 0x2b5   : > { %1025 = vmax.xlane.f32.xlu0 %v3193_v5 }
 0x2b6   : > { %v3205_v9 = vpop.f32.mrf.mxu0 }
 0x2b7   : > { %1023 = vmax.xlane.f32.xlu1 %v3202_v8 }
 0x2b8   : > { %v3208_v10 = vpop.f32.mrf.mxu0 }
 0x2b9   : > { %1029 = vmax.xlane.f32.xlu0 %v3208_v10 }
 0x2ba   : > { %v3211_v11 = vpop.f32.mrf.mxu0 }
 0x2bb   : > { %1035 = vmax.xlane.f32.xlu1 %v3211_v11 }
 0x2bc   : > { %v3215_v12 = vpop.f32.mrf.mxu0 }
 0x2bd   : > { %1033 = vmax.xlane.f32.xlu0 %v3205_v9 }
 0x2bf   : > { %1031 = vmax.xlane.f32.xlu1 %v3215_v12 }
 0x328   : > { %v1010_v16 = vpop.xlane.xlu1 %1009 }
 0x329   : > { %v3225_v18 = vmax.f32 %v3219_v14, %v1010_v16 }
 0x32a   : > { %v1006_v19 = vpop.xlane.xlu0 %1005 }
 0x32b   : > { %1545 = vst.msk [vmem:[#allocation3 + $0x10] sm:$0xff] %vm1542_vm1, %v3225_v18  ;;  %v3233_v22 = vmax.f32 %v3222_v17, %v1006_v19  ;;  %1113 = vperm.xlu1 %2372, %v3225_v18  }
 0x32c   : > { %v1012_v23 = vpop.xlane.xlu1 %1011 }
 0x32d   : > { %1543 = vst.msk [vmem:[#allocation3] sm:$0xff] %vm1542_vm1, %v3233_v22  ;;  %v3239_v25 = vmax.f32 %v3227_v20, %v1012_v23  ;;  %1103 = vperm.xlu0 %2371, %v3233_v22   ;;  %v1053_v16 = vsub.f32 %v3222_v17, %v3233_v22  ;;  %v1002_v22 = vld [vmem:[#allocation3 + $0x68] sm:$0xff] }
 0x32e   : > { %v1008_v26 = vpop.xlane.xlu0 %1007 }
 0x32f   : > { %1546 = vst.msk [vmem:[#allocation3 + $0x18] sm:$0xff] %vm1542_vm1, %v3239_v25  ;;  %v1038_v28 = vmax.f32 %v990_v24, %v1008_v26  ;;  %1118 = vperm.xlu1 %2372, %v3239_v25   ;;  %v1056_v58 = vsub.f32 %v3227_v20, %v3239_v25  ;;  %v1055_v26 = vsub.f32 %v3219_v14, %v3225_v18  ;;  %v1069_v27 = vmul.f32 1.442695, %v1053_v16 }
 0x331   : > { %1544 = vst.msk [vmem:[#allocation3 + $0x8] sm:$0xff] %vm1542_vm1, %v1038_v28  ;;  %v1054_v50 = vsub.f32 %v990_v24, %v1038_v28  ;;  %v1075_v23 = vmul.f32 1.442695, %v1056_v58  ;;  %v1073_v14 = vmul.f32 1.442695, %v1055_v26 }
 0x332   : > { %v1014_v30 = vpop.xlane.xlu0 %1013 }
 0x333   : > { %v3253_v33 = vmax.f32 %v3246_v29, %v1014_v30  ;;  %1108 = vperm.xlu1 %2372, %v1038_v28   ;;  %v1071_v59 = vmul.f32 1.442695, %v1054_v50 }
 0x334   : > { %v1020_v35 = vpop.xlane.xlu1 %1019 }
 0x335   : > { %1547 = vst.msk [vmem:[#allocation3 + $0x20] sm:$0xff] %vm1542_vm1, %v3253_v33  ;;  %v3260_v37 = vmax.f32 %v3249_v31, %v1020_v35  ;;  %2397 = vpow2.f32 %v1071_v59  ;;  %v1057_v18 = vsub.f32 %v3246_v29, %v3253_v33 }
 0x336   : > { %v1018_v38 = vpop.xlane.xlu0 %1017  ;;  %2399 = vpow2.f32 %v1075_v23 }
 0x337   : > { %1550 = vst.msk [vmem:[#allocation3 + $0x38] sm:$0xff] %vm1542_vm1, %v3260_v37  ;;  %v3268_v41 = vmax.f32 %v3255_v34, %v1018_v38  ;;  %v1060_v24 = vsub.f32 %v3249_v31, %v3260_v37  ;;  %2401 = vpow2.f32 %v1069_v27 }
 0x338   : > { %v1016_v42 = vpop.xlane.xlu1 %1015 }
 0x339   : > { %1549 = vst.msk [vmem:[#allocation3 + $0x30] sm:$0xff] %vm1542_vm1, %v3268_v41  ;;  %v3275_v44 = vmax.f32 %v3262_v39, %v1016_v42  ;;  %1133 = vperm.xlu1 %2372, %v3268_v41   ;;  %v1083_v31 = vmul.f32 1.442695, %v1060_v24  ;;  %v1059_v40 = vsub.f32 %v3255_v34, %v3268_v41 }
 0x33a   : > { %v1022_v36 = vpop.xlane.xlu0 %1021 }
 0x33b   : > { %1548 = vst.msk [vmem:[#allocation3 + $0x28] sm:$0xff] %vm1542_vm1, %v3275_v44  ;;  %v3284_v47 = vmax.f32 %v3270_v43, %v1022_v36  ;;  %v1058_v32 = vsub.f32 %v3262_v39, %v3275_v44  ;;  %2403 = vpow2.f32 %v1083_v31  ;;  %v1077_v39 = vmul.f32 1.442695, %v1057_v18 }
 0x33c   : > { %v1028_v48 = vpop.xlane.xlu1 %1027  ;;  %2405 = vpow2.f32 %v1073_v14 }
 0x33d   : > { %1551 = vst.msk [vmem:[#allocation3 + $0x40] sm:$0xff] %vm1542_vm1, %v3284_v47  ;;  %v1048_v51 = vmax.f32 %v3278_v45, %v1028_v48  ;;  %1123 = vperm.xlu1 %2372, %v3253_v33   ;;  %v1081_v33 = vmul.f32 1.442695, %v1059_v40  ;;  %v1061_v41 = vsub.f32 %v3270_v43, %v3284_v47 }
 0x33e   : > { %v1026_v52 = vpop.xlane.xlu0 %1025 }
 0x33f   : > { %1554 = vst.msk [vmem:[#allocation3 + $0x58] sm:$0xff] %vm1542_vm1, %v1048_v51  ;;  %v3297_v55 = vmax.f32 %v3286_v49, %v1026_v52  ;;  %v1064_v38 = vsub.f32 %v3278_v45, %v1048_v51 }
 0x340   : > { %v1024_v56 = vpop.xlane.xlu1 %1023 }
 0x341   : > { %1553 = vst.msk [vmem:[#allocation3 + $0x50] sm:$0xff] %vm1542_vm1, %v3297_v55  ;;  %v1046_v3 = vmax.f32 %v3292_v53, %v1024_v56  ;;  %1128 = vperm.xlu1 %2372, %v3275_v44   ;;  %v1091_v42 = vmul.f32 1.442695, %v1064_v38  ;;  %v1063_v36 = vsub.f32 %v3286_v49, %v3297_v55 }
 0x342   : > { %v1030_v13 = vpop.xlane.xlu0 %1029  ;;  %v2398_v29 = vpop.eup %2397 }
 0x343   : > { %1552 = vst.msk [vmem:[#allocation3 + $0x48] sm:$0xff] %vm1542_vm1, %v1046_v3  ;;  %v3313_v19 = vmax.f32 %v3299_v57, %v1030_v13  ;;  %1148 = vperm.xlu0 %2371, %v1046_v3   ;;  %v1062_v44 = vsub.f32 %v3292_v53, %v1046_v3  ;;  %v2400_v34 = vpop.eup %2399  ;;  %v1089_v48 = vmul.f32 1.442695, %v1063_v36  ;;  %v1085_v53 = vmul.f32 1.442695, %v1061_v41 }
 0x344   : > { %v1036_v20 = vpop.xlane.xlu1 %1035  ;;  %v2402_v50 = vpop.eup %2401 }
 0x345   : > { %1555 = vst.msk [vmem:[#allocation3 + $0x60] sm:$0xff] %vm1542_vm1, %v3313_v19  ;;  %v1052_v25 = vmax.f32 %v3307_v15, %v1036_v20  ;;  %1138 = vperm.xlu1 %2372, %v3260_v37   ;;  %v1079_v37 = vmul.f32 1.442695, %v1058_v32  ;;  %v1087_v45 = vmul.f32 1.442695, %v1062_v44  ;;  %v1065_v54 = vsub.f32 %v3299_v57, %v3313_v19 }
 0x346   : > { %v1034_v17 = vpop.xlane.xlu0 %1033 }
 0x347   : > { %1558 = vst.msk [vmem:[#allocation3 + $0x78] sm:$0xff] %vm1542_vm1, %v1052_v25  ;;  %v3327_v28 = vmax.f32 %v3315_v21, %v1034_v17  ;;  %1158 = vperm.xlu0 %2371, %v1048_v51   ;;  %2407 = vpow2.f32 %v1079_v37  ;;  %v1068_v51 = vsub.f32 %v3307_v15, %v1052_v25 }
 0x348   : > { %v1032_v30 = vpop.xlane.xlu1 %1031  ;;  %2409 = vpow2.f32 %v1077_v39  ;;  %v2404_v49 = vpop.eup %2403 }
 0x349   : > { %1557 = vst.msk [vmem:[#allocation3 + $0x70] sm:$0xff] %vm1542_vm1, %v3327_v28  ;;  %v1050_v35 = vmax.f32 %v1002_v22, %v1032_v30  ;;  %1143 = vperm.xlu1 %2372, %v3284_v47   ;;  %2411 = vpow2.f32 %v1091_v42  ;;  %v1099_v56 = vmul.f32 1.442695, %v1068_v51  ;;  %v1093_v47 = vmul.f32 1.442695, %v1065_v54 }
 0x34a   : > { %2413 = vpow2.f32 %v1081_v33  ;;  %v1067_v58 = vsub.f32 %v3315_v21, %v3327_v28 }
 0x34b   : > { %1556 = vst.msk [vmem:[#allocation3 + $0x68] sm:$0xff] %vm1542_vm1, %v1050_v35  ;;  %1168 = vperm.xlu0 %2371, %v1050_v35   ;;  %v1066_v46 = vsub.f32 %v1002_v22, %v1050_v35  ;;  %2415 = vpow2.f32 %v1087_v45 }
 0x34c   : > { %2417 = vpow2.f32 %v1089_v48  ;;  %v1097_v13 = vmul.f32 1.442695, %v1067_v58 }
 0x34d   : > { %1153 = vperm.xlu1 %2372, %v3297_v55   ;;  %v1095_v52 = vmul.f32 1.442695, %v1066_v46  ;;  %v2406_v55 = vpop.eup %2405 }
 0x34f   : > { %1178 = vperm.xlu0 %2371, %v1052_v25   ;;  %2419 = vpow2.f32 %v1095_v52 }
 0x350   : > { %2421 = vpow2.f32 %v1085_v53 }
 0x351   : > { %1163 = vperm.xlu1 %2372, %v3313_v19   ;;  %2423 = vpow2.f32 %v1099_v56 }
 0x352   : > { %2425 = vpow2.f32 %v1093_v47 }
 0x353   : > { %1260 = vperm.xlu0 %2371, %v2398_v29   ;;  %2427 = vpow2.f32 %v1097_v13 }
 0x354   : > { %v2408_v43 = vpop.eup %2407 }
 0x355   : > { %1173 = vperm.xlu1 %2372, %v3327_v28   ;;  %v2410_v59 = vpop.eup %2409 }
 0x356   : > { %v2412_v3 = vpop.eup %2411 }
 0x357   : > { %1270 = vperm.xlu0 %2371, %v2400_v34   ;;  %v2414_v57 = vpop.eup %2413 }
 0x358   : > { %v2416_v15 = vpop.eup %2415 }
 0x359   : > { %1255 = vperm.xlu1 %2372, %v2402_v50   ;;  %v2418_v16 = vpop.eup %2417 }
 0x35b   : > { %1290 = vperm.xlu0 %2371, %v2404_v49  }
 0x35c   : > { %v2420_v19 = vpop.eup %2419 }
 0x35d   : > { %1265 = vperm.xlu1 %2372, %v2406_v55   ;;  %v2422_v20 = vpop.eup %2421 }
 0x35e   : > { %v2424_v21 = vpop.eup %2423 }
 0x35f   : > { %1280 = vperm.xlu0 %2371, %v2408_v43   ;;  %v2426_v23 = vpop.eup %2425 }
 0x360   : > { %v2428_v24 = vpop.eup %2427 }
 0x361   : > { %1275 = vperm.xlu1 %2372, %v2410_v59  }
 0x363   : > { %1310 = vperm.xlu0 %2371, %v2412_v3  }
 0x365   : > { %1285 = vperm.xlu1 %2372, %v2414_v57  }
 0x367   : > { %1300 = vperm.xlu0 %2371, %v2416_v15  }
 0x369   : > { %1305 = vperm.xlu1 %2372, %v2418_v16  }
 0x36b   : > { %1320 = vperm.xlu0 %2371, %v2420_v19  }
 0x36d   : > { %1295 = vperm.xlu1 %2372, %v2422_v20  }
 0x36f   : > { %1330 = vperm.xlu0 %2371, %v2424_v21  }
 0x371   : > { %1315 = vperm.xlu1 %2372, %v2426_v23  }
 0x375   : > { %1325 = vperm.xlu1 %2372, %v2428_v24  }
 0x3a6   : > { %v1114_v25 = vpop.permute.xlu1 %1113 }
 0x3a7   : > { %v1183_v28 = vsub.f32 %v3170_v60, %v1114_v25 }
 0x3a8   : > { %v1104_v17 = vpop.permute.xlu0 %1103 }
 0x3a9   : > { %v1181_v22 = vsub.f32 %v3173_v61, %v1104_v17  ;;  %v1201_v14 = vmul.f32 1.442695, %v1183_v28 }
 0x3aa   : > { %v1119_v26 = vpop.permute.xlu1 %1118 }
 0x3ab   : > { %v1184_v27 = vsub.f32 %v3176_v62, %v1119_v26  ;;  %v1197_v30 = vmul.f32 1.442695, %v1181_v22 }
 0x3ad   : > { %v1203_v31 = vmul.f32 1.442695, %v1184_v27  ;;  %2429 = vpow2.f32 %v1197_v30 }
 0x3ae   : > { %v1109_v32 = vpop.permute.xlu1 %1108 }
 0x3af   : > { %v1182_v35 = vsub.f32 %v3179_v63, %v1109_v32  ;;  %2431 = vpow2.f32 %v1203_v31 }
 0x3b1   : > { %v1199_v18 = vmul.f32 1.442695, %v1182_v35 }
 0x3b3   : > { %2433 = vpow2.f32 %v1199_v18  ;;  %v1239_v18 = vld [vmem:[#allocation5 + $0x58] sm:$0xff] }
 0x3b4   : > { %2435 = vpow2.f32 %v1201_v14  ;;  %v1134_v37 = vpop.permute.xlu1 %1133 }
 0x3b5   : > { %v1187_v39 = vsub.f32 %v3182_v0, %v1134_v37 }
 0x3b7   : > { %v1209_v36 = vmul.f32 1.442695, %v1187_v39 }
 0x3b8   : > { %v1124_v38 = vpop.permute.xlu1 %1123 }
 0x3b9   : > { %v1185_v61 = vsub.f32 %v3184_v1, %v1124_v38  ;;  %v1237_v38 = vld [vmem:[#allocation5 + $0x30] sm:$0xff] }
 0x3ba   : > { %v2430_v42 = vpop.eup %2429 }
 0x3bb   : > { %v1205_v62 = vmul.f32 1.442695, %v1185_v61 }
 0x3bc   : > { %v1129_v40 = vpop.permute.xlu1 %1128  ;;  %v2432_v29 = vpop.eup %2431 }
 0x3bd   : > { %v1186_v60 = vsub.f32 %v3190_v4, %v1129_v40  ;;  %2437 = vpow2.f32 %v1205_v62  ;;  %v1240_v62 = vld [vmem:[#allocation5 + $0x18] sm:$0xff] }
 0x3be   : > { %v1149_v44 = vpop.permute.xlu0 %1148 }
 0x3bf   : > { %v1207_v63 = vmul.f32 1.442695, %v1186_v60  ;;  %v1190_v45 = vsub.f32 %v3202_v8, %v1149_v44  ;;  %v1238_v44 = vld [vmem:[#allocation5] sm:$0xff] }
 0x3c0   : > { %v2434_v33 = vpop.eup %2433  ;;  %v1139_v46 = vpop.permute.xlu1 %1138 }
 0x3c1   : > { %v2436_v34 = vpop.eup %2435  ;;  %2439 = vpow2.f32 %v1207_v63  ;;  %v1188_v1 = vsub.f32 %v3187_v2, %v1139_v46  ;;  %v1229_v41 = vpack.c.bf16 %v2434_v33, %v2430_v42  ;;  %v1215_v4 = vmul.f32 1.442695, %v1190_v45 }
 0x3c2   : > { %v1159_v0 = vpop.permute.xlu0 %1158  ;;  %v1230_v48 = vpack.c.bf16 %v2432_v29, %v2436_v34  ;;  %2441 = vpow2.f32 %v1209_v36 }
 0x3c3   : > { %v1211_v50 = vmul.f32 1.442695, %v1188_v1  ;;  %2182 = vmatprep.mubr.bf16.mxu1 %v1229_v41  ;;  %v1192_v51 = vsub.f32 %v3199_v7, %v1159_v0 }
 0x3c4   : > { %2183 = vmatmul.mubr.bf16.vlgmr.msra.gmra.mxu1 %v1230_v48  ;;  %v1144_v52 = vpop.permute.xlu1 %1143 }
 0x3c5   : > { %2443 = vpow2.f32 %v1211_v50  ;;  %v1189_v49 = vsub.f32 %v3196_v6, %v1144_v52  ;;  %v1219_v54 = vmul.f32 1.442695, %v1192_v51  ;;  %v1241_v51 = vld [vmem:[#allocation5 + $0x50] sm:$0xff] }
 0x3c6   : > { %v1169_v8 = vpop.permute.xlu0 %1168  ;;  %2445 = vpow2.f32 %v1215_v4  ;;  %v1243_v4 = vld [vmem:[#allocation5 + $0x8] sm:$0xff] }
 0x3c7   : > { %v1213_v53 = vmul.f32 1.442695, %v1189_v49  ;;  %v1194_v2 = vsub.f32 %v3215_v12, %v1169_v8  ;;  %v1244_v8 = vld [vmem:[#allocation5 + $0x48] sm:$0xff] }
 0x3c8   : > { %v1154_v55 = vpop.permute.xlu1 %1153 }
 0x3c9   : > { %2447 = vpow2.f32 %v1213_v53  ;;  %v1191_v56 = vsub.f32 %v3193_v5, %v1154_v55  ;;  %v1223_v58 = vmul.f32 1.442695, %v1194_v2 }
 0x3ca   : > { %v1179_v43 = vpop.permute.xlu0 %1178  ;;  %2449 = vpow2.f32 %v1219_v54  ;;  %v2438_v3 = vpop.eup %2437 }
 0x3cb   : > { %v1217_v47 = vmul.f32 1.442695, %v1191_v56  ;;  %v1196_v7 = vsub.f32 %v3211_v11, %v1179_v43  ;;  %v1242_v56 = vld [vmem:[#allocation5 + $0x68] sm:$0xff] }
 0x3cc   : > { %v1164_v59 = vpop.permute.xlu1 %1163 }
 0x3cd   : > { %2451 = vpow2.f32 %v1217_v47  ;;  %v1193_v6 = vsub.f32 %v3208_v10, %v1164_v59  ;;  %v1227_v12 = vmul.f32 1.442695, %v1196_v7  ;;  %v1247_v59 = vld [vmem:[#allocation5 + $0x10] sm:$0xff] }
 0x3ce   : > { %v2440_v13 = vpop.eup %2439  ;;  %2453 = vpow2.f32 %v1223_v58  ;;  %v1261_v35 = vpop.permute.xlu0 %1260 }
 0x3cf   : > { %v1221_v57 = vmul.f32 1.442695, %v1193_v6  ;;  %v1231_v15 = vpack.c.bf16 %v2440_v13, %v2438_v3  ;;  %v2442_v19 = vpop.eup %2441  ;;  %v1334_v46 = vmul.f32 %v1261_v35, %v1238_v44 }
 0x3d0   : > { %v1174_v16 = vpop.permute.xlu1 %1173 }
 0x3d1   : > { %2455 = vpow2.f32 %v1221_v57  ;;  %v1195_v5 = vsub.f32 %v3205_v9, %v1174_v16  ;;  %2186 = vmatprep.mubr.bf16.mxu1 %v1231_v15  ;;  %v1245_v57 = vld [vmem:[#allocation5 + $0x40] sm:$0xff] }
 0x3d2   : > { %v2444_v20 = vpop.eup %2443  ;;  %2457 = vpow2.f32 %v1227_v12  ;;  %v1271_v37 = vpop.permute.xlu0 %1270 }
 0x3d3   : > { %v1225_v21 = vmul.f32 1.442695, %v1195_v5  ;;  %v1232_v23 = vpack.c.bf16 %v2444_v20, %v2442_v19  ;;  %v2446_v11 = vpop.eup %2445  ;;  %v1336_v63 = vmul.f32 %v1271_v37, %v1240_v62  ;;  %v1248_v5 = vld [vmem:[#allocation5 + $0x38] sm:$0xff] }
 0x3d4   : > { %v1256_v32 = vpop.permute.xlu1 %1255 }
 0x3d5   : > { %2459 = vpow2.f32 %v1225_v21  ;;  %2187 = vmatmul.mubr.bf16.gmra.mxu1 %v1232_v23  ;;  %v1333_v60 = vmul.f32 %v1256_v32, %v1237_v38 }
 0x3d6   : > { %v2448_v24 = vpop.eup %2447  ;;  %v1291_v33 = vpop.permute.xlu0 %1290 }
 0x3d7   : > { %v1233_v10 = vpack.c.bf16 %v2446_v11, %v2448_v24  ;;  %v2450_v25 = vpop.eup %2449  ;;  %v1340_v47 = vmul.f32 %v1291_v33, %v1244_v8  ;;  %v1246_v11 = vld [vmem:[#allocation5 + $0x20] sm:$0xff] }
 0x3d8   : > { %v1266_v14 = vpop.permute.xlu1 %1265 }
 0x3d9   : > { %2190 = vmatprep.mubr.bf16.mxu1 %v1233_v10  ;;  %v1335_v61 = vmul.f32 %v1266_v14, %v1239_v18  ;;  %v1252_v14 = vld [vmem:[#allocation5 + $0x28] sm:$0xff] }
 0x3da   : > { %v2452_v17 = vpop.eup %2451  ;;  %v1281_v48 = vpop.permute.xlu0 %1280 }
 0x3db   : > { %v1234_v22 = vpack.c.bf16 %v2450_v25, %v2452_v17  ;;  %v2454_v26 = vpop.eup %2453  ;;  %v1338_v6 = vmul.f32 %v1281_v48, %v1242_v56 }
 0x3dc   : > { %v1276_v39 = vpop.permute.xlu1 %1275 }
 0x3dd   : > { %2191 = vmatmul.mubr.bf16.gmra.mxu1 %v1234_v22  ;;  %v1337_v2 = vmul.f32 %v1276_v39, %v1241_v51  ;;  %v1251_v22 = vld [vmem:[#allocation5 + $0x78] sm:$0xff]  ;;  %v1250_v39 = vld [vmem:[#allocation5 + $0x70] sm:$0xff] }
 0x3de   : > { %v2456_v27 = vpop.eup %2455  ;;  %v1311_v52 = vpop.permute.xlu0 %1310 }
 0x3df   : > { %v1235_v28 = vpack.c.bf16 %v2454_v26, %v2456_v27  ;;  %v2458_v30 = vpop.eup %2457  ;;  %v1344_v25 = vmul.f32 %v1311_v52, %v1248_v5 }
 0x3e0   : > { %v1286_v34 = vpop.permute.xlu1 %1285 }
 0x3e1   : > { %2194 = vmatprep.mubr.bf16.mxu1 %v1235_v28  ;;  %v1339_v49 = vmul.f32 %v1286_v34, %v1243_v4 }
 0x3e2   : > { %v2460_v9 = vpop.eup %2459  ;;  %v1301_v7 = vpop.permute.xlu0 %1300 }
 0x3e3   : > { %v1236_v31 = vpack.c.bf16 %v2458_v30, %v2460_v9  ;;  %v1342_v28 = vmul.f32 %v1301_v7, %v1246_v11  ;;  %v1249_v9 = vld [vmem:[#allocation5 + $0x60] sm:$0xff] }
 0x3e4   : > { %v1306_v50 = vpop.permute.xlu1 %1305 }
 0x3e5   : > { %2195 = vmatmul.mubr.bf16.gmra.mxu1 %v1236_v31  ;;  %v1343_v16 = vmul.f32 %v1306_v50, %v1247_v59 }
 0x3e6   : > { %v1321_v24 = vpop.permute.xlu0 %1320 }
 0x3e7   : > { %v1346_v44 = vmul.f32 %v1321_v24, %v1250_v39 }
 0x3e8   : > { %v1296_v53 = vpop.permute.xlu1 %1295 }
 0x3e9   : > { %v1341_v21 = vmul.f32 %v1296_v53, %v1245_v57 }
 0x3ea   : > { %v1331_v18 = vpop.permute.xlu0 %1330 }
 0x3ec   : > { %v1316_v15 = vpop.permute.xlu1 %1315 }
 0x3ed   : > { %v1345_v38 = vmul.f32 %v1316_v15, %v1249_v9 }
 0x3f0   : > { %v1326_v26 = vpop.permute.xlu1 %1325 }
 0x3f1   : > { %v1347_v32 = vmul.f32 %v1326_v26, %v1251_v22 }
 0x484   : > { %v2184_v40 = vpop.f32.mrf.mxu1 }
 0x485   : > { %v1512_v42 = vadd.f32 %v2184_v40, %v1335_v61  ;;  %v1348_v40 = vmul.f32 %v1331_v18, %v1252_v14 }
 0x486   : > { %v1447_v29 = vpop.f32.mrf.mxu1 }
 0x487   : > { %1528 = vst [vmem:[#allocation5 + $0x58] sm:$0xff] %v1512_v42  ;;  %v1510_v36 = vadd.f32 %v1447_v29, %v1333_v60 }
 0x488   : > { %v2185_v45 = vpop.f32.mrf.mxu1 }
 0x489   : > { %1526 = vst [vmem:[#allocation5 + $0x30] sm:$0xff] %v1510_v36  ;;  %v1513_v1 = vadd.f32 %v2185_v45, %v1336_v63 }
 0x48a   : > { %v1450_v41 = vpop.f32.mrf.mxu1 }
 0x48b   : > { %1529 = vst [vmem:[#allocation5 + $0x18] sm:$0xff] %v1513_v1  ;;  %v1511_v0 = vadd.f32 %v1450_v41, %v1334_v46 }
 0x48d   : > { %1527 = vst [vmem:[#allocation5] sm:$0xff] %v1511_v0 }
 0x495   : > { %v2188_v54 = vpop.f32.mrf.mxu1 }
 0x496   : > { %v1516_v55 = vadd.f32 %v2188_v54, %v1339_v49 }
 0x497   : > { %v1463_v43 = vpop.f32.mrf.mxu1 }
 0x498   : > { %1532 = vst [vmem:[#allocation5 + $0x8] sm:$0xff] %v1516_v55  ;;  %v1514_v58 = vadd.f32 %v1463_v43, %v1337_v2 }
 0x499   : > { %v2189_v3 = vpop.f32.mrf.mxu1 }
 0x49a   : > { %1530 = vst [vmem:[#allocation5 + $0x50] sm:$0xff] %v1514_v58  ;;  %v1517_v13 = vadd.f32 %v2189_v3, %v1340_v47 }
 0x49b   : > { %v1466_v12 = vpop.f32.mrf.mxu1 }
 0x49c   : > { %1533 = vst [vmem:[#allocation5 + $0x48] sm:$0xff] %v1517_v13  ;;  %v1515_v19 = vadd.f32 %v1466_v12, %v1338_v6 }
 0x49d   : > { %v2192_v20 = vpop.f32.mrf.mxu1 }
 0x49e   : > { %1531 = vst [vmem:[#allocation5 + $0x68] sm:$0xff] %v1515_v19  ;;  %v1520_v23 = vadd.f32 %v2192_v20, %v1343_v16 }
 0x49f   : > { %v1479_v10 = vpop.f32.mrf.mxu1 }
 0x4a0   : > { %1536 = vst [vmem:[#allocation5 + $0x10] sm:$0xff] %v1520_v23  ;;  %v1518_v17 = vadd.f32 %v1479_v10, %v1341_v21 }
 0x4a1   : > { %v2193_v27 = vpop.f32.mrf.mxu1 }
 0x4a2   : > { %1534 = vst [vmem:[#allocation5 + $0x40] sm:$0xff] %v1518_v17  ;;  %v1521_v30 = vadd.f32 %v2193_v27, %v1344_v25 }
 0x4a3   : > { %v1482_v31 = vpop.f32.mrf.mxu1 }
 0x4a4   : > { %1537 = vst [vmem:[#allocation5 + $0x38] sm:$0xff] %v1521_v30  ;;  %v1519_v35 = vadd.f32 %v1482_v31, %v1342_v28 }
 0x4a5   : > { %v2196_v37 = vpop.f32.mrf.mxu1 }
 0x4a6   : > { %1535 = vst [vmem:[#allocation5 + $0x20] sm:$0xff] %v1519_v35  ;;  %v1524_v61 = vadd.f32 %v2196_v37, %v1347_v32 }
 0x4a7   : > { %v1495_v62 = vpop.f32.mrf.mxu1 }
 0x4a8   : > { %1540 = vst [vmem:[#allocation5 + $0x78] sm:$0xff] %v1524_v61  ;;  %v1522_v60 = vadd.f32 %v1495_v62, %v1345_v38 }
 0x4a9   : > { %v2197_v42 = vpop.f32.mrf.mxu1 }
 0x4aa   : > { %1538 = vst [vmem:[#allocation5 + $0x60] sm:$0xff] %v1522_v60  ;;  %v1525_v29 = vadd.f32 %v2197_v42, %v1348_v40  ;;  %1562 = sbr.rel (%p1984_p9) target bundleno = 1372 (0x55c), region = 68 }
 0x4ab   : > { %v1498_v63 = vpop.f32.mrf.mxu1 }
 0x4ac   : > { %1541 = vst [vmem:[#allocation5 + $0x28] sm:$0xff] %v1525_v29  ;;  %v1523_v33 = vadd.f32 %v1498_v63, %v1346_v44 }
 0x4ae   : > { %1539 = vst [vmem:[#allocation5 + $0x70] sm:$0xff] %v1523_v33 }
 0x4af   : > { %v3370_v36 = vld [vmem:[#allocation5 + $0x58] sm:$0xff]  ;;  %v3372_v45 = vld [vmem:[#allocation5 + $0x30] sm:$0xff]  ;;  %v2762_v34 = vmov 4   ;;  %v3377_v1 = vld [vmem:[#allocation5] sm:$0xff] }
 0x4b0   : > { %v3374_v46 = vld [vmem:[#allocation5 + $0x18] sm:$0xff]  ;;  %2462 = vset.pattern.permute.xlu1 %v2762_v34  ;;  %2461 = vset.pattern.permute.xlu0 %v2762_v34  ;;  %2463 = vrcp.f32 %v3370_v36  ;;  %v3382_v41 = vld [vmem:[#allocation5 + $0x68] sm:$0xff]  ;;  %v3384_v0 = vld [vmem:[#allocation5 + $0x50] sm:$0xff] }
 0x4b1   : > { %2465 = vrcp.f32 %v3372_v45  ;;  %v3388_v48 = vld [vmem:[#allocation5 + $0x48] sm:$0xff]  ;;  %v3394_v4 = vld [vmem:[#allocation5 + $0x20] sm:$0xff]  ;;  %v3400_v53 = vld [vmem:[#allocation5 + $0x38] sm:$0xff] }
 0x4b2   : > { %2467 = vrcp.f32 %v3374_v46  ;;  %v3390_v50 = vld [vmem:[#allocation5 + $0x8] sm:$0xff]  ;;  %v3396_v51 = vld [vmem:[#allocation5 + $0x40] sm:$0xff]  ;;  %v3402_v2 = vld [vmem:[#allocation5 + $0x10] sm:$0xff] }
 0x4b3   : > { %2469 = vrcp.f32 %v3377_v1  ;;  %v3408_v47 = vld [vmem:[#allocation5 + $0x60] sm:$0xff]  ;;  %v3412_v7 = vld [vmem:[#allocation5 + $0x28] sm:$0xff]  ;;  %v3414_v3 = vld [vmem:[#allocation5 + $0x78] sm:$0xff] }
 0x4b4   : > { %2471 = vrcp.f32 %v3382_v41  ;;  %v1597_v20 = vld [vmem:[%s3059_s3 + $0x10] sm:$0xff]  ;;  %v1595_v11 = vld [vmem:[%s3059_s3] sm:$0xff]  ;;  %v1598_v22 = vld [vmem:[%s3059_s3 + $0x18] sm:$0xff] }
 0x4b5   : > { %2473 = vrcp.f32 %v3384_v0  ;;  %v3406_v56 = vld [vmem:[#allocation5 + $0x70] sm:$0xff]  ;;  %v1596_v28 = vld [vmem:[%s3059_s3 + $0x8] sm:$0xff]  ;;  %v1599_v37 = vld [vmem:[%s3059_s3 + $0x20] sm:$0xff] }
 0x4b6   : > { %2475 = vrcp.f32 %v3388_v48  ;;  %v1600_v35 = vld [vmem:[%s3059_s3 + $0x28] sm:$0xff]  ;;  %v1602_v40 = vld [vmem:[%s3059_s3 + $0x38] sm:$0xff]  ;;  %v1601_v44 = vld [vmem:[%s3059_s3 + $0x30] sm:$0xff] }
 0x4b7   : > { %2477 = vrcp.f32 %v3390_v50 }
 0x4b8   : > { %2479 = vrcp.f32 %v3394_v4 }
 0x4b9   : > { %2481 = vrcp.f32 %v3396_v51 }
 0x4ba   : > { %2483 = vrcp.f32 %v3400_v53 }
 0x4bb   : > { %2485 = vrcp.f32 %v3402_v2 }
 0x4bc   : > { %2487 = vrcp.f32 %v3406_v56 }
 0x4bd   : > { %v2464_v52 = vpop.eup %2463  ;;  %2489 = vrcp.f32 %v3408_v47 }
 0x4be   : > { %v2466_v49 = vpop.eup %2465  ;;  %1623 = vperm.xlu1 %2462, %v2464_v52   ;;  %2491 = vrcp.f32 %v3412_v7 }
 0x4bf   : > { %v2468_v8 = vpop.eup %2467  ;;  %1613 = vperm.xlu0 %2461, %v2466_v49   ;;  %2493 = vrcp.f32 %v3414_v3 }
 0x4c0   : > { %v2470_v54 = vpop.eup %2469 }
 0x4c1   : > { %v2472_v55 = vpop.eup %2471 }
 0x4c2   : > { %1628 = vperm.xlu1 %2462, %v2468_v8   ;;  %v2474_v43 = vpop.eup %2473 }
 0x4c3   : > { %1618 = vperm.xlu0 %2461, %v2470_v54   ;;  %v2476_v58 = vpop.eup %2475  ;;  %v1605_v54 = vld [vmem:[%s3059_s3 + $0x50] sm:$0xff] }
 0x4c4   : > { %v2478_v59 = vpop.eup %2477 }
 0x4c5   : > { %v2480_v6 = vpop.eup %2479 }
 0x4c6   : > { %1638 = vperm.xlu1 %2462, %v2472_v55   ;;  %v2482_v13 = vpop.eup %2481 }
 0x4c7   : > { %1633 = vperm.xlu0 %2461, %v2474_v43   ;;  %v2484_v57 = vpop.eup %2483 }
 0x4c8   : > { %v2486_v15 = vpop.eup %2485 }
 0x4c9   : > { %v2488_v12 = vpop.eup %2487 }
 0x4ca   : > { %1648 = vperm.xlu1 %2462, %v2476_v58   ;;  %v2490_v16 = vpop.eup %2489 }
 0x4cb   : > { %1643 = vperm.xlu0 %2461, %v2478_v59   ;;  %v2492_v19 = vpop.eup %2491 }
 0x4cc   : > { %v2494_v5 = vpop.eup %2493 }
 0x4ce   : > { %1658 = vperm.xlu1 %2462, %v2480_v6  }
 0x4cf   : > { %1653 = vperm.xlu0 %2461, %v2482_v13   ;;  %v1607_v13 = vld [vmem:[%s3059_s3 + $0x60] sm:$0xff] }
 0x4d2   : > { %1668 = vperm.xlu1 %2462, %v2484_v57  }
 0x4d3   : > { %1663 = vperm.xlu0 %2461, %v2486_v15  }
 0x4d6   : > { %1678 = vperm.xlu1 %2462, %v2488_v12  }
 0x4d7   : > { %1673 = vperm.xlu0 %2461, %v2490_v16   ;;  %v1610_v16 = vld [vmem:[%s3059_s3 + $0x78] sm:$0xff] }
 0x4da   : > { %1688 = vperm.xlu1 %2462, %v2492_v19  }
 0x4db   : > { %1683 = vperm.xlu0 %2461, %v2494_v5   ;;  %v1609_v5 = vld [vmem:[%s3059_s3 + $0x70] sm:$0xff] }
 0x539   : > { %v1624_v21 = vpop.permute.xlu1 %1623 }
 0x53a   : > { %v1693_v23 = vmul.f32 %v1624_v21, %v3370_v36  ;;  %v1614_v24 = vpop.permute.xlu0 %1613 }
 0x53b   : > { %v1691_v10 = vmul.f32 %v1614_v24, %v3372_v45  ;;  %v1604_v45 = vld [vmem:[%s3059_s3 + $0x48] sm:$0xff] }
 0x53c   : > { %v1709_v25 = vadd.f32 %v1693_v23, %v1597_v20 }
 0x53d   : > { %v1707_v17 = vadd.f32 %v1691_v10, %v1595_v11  ;;  %v1629_v26 = vpop.permute.xlu1 %1628 }
 0x53e   : > { %1725 = vst [vmem:[%s3079_s4 + $0x10] sm:$0xff] %v1709_v25  ;;  %v1694_v27 = vmul.f32 %v1629_v26, %v3374_v46  ;;  %v1619_v30 = vpop.permute.xlu0 %1618 }
 0x53f   : > { %1723 = vst [vmem:[%s3079_s4] sm:$0xff] %v1707_v17  ;;  %v1692_v9 = vmul.f32 %v1619_v30, %v3377_v1  ;;  %v1603_v1 = vld [vmem:[%s3059_s3 + $0x40] sm:$0xff] }
 0x540   : > { %v1710_v31 = vadd.f32 %v1694_v27, %v1598_v22 }
 0x541   : > { %v1708_v32 = vadd.f32 %v1692_v9, %v1596_v28  ;;  %v1639_v14 = vpop.permute.xlu1 %1638 }
 0x542   : > { %1726 = vst [vmem:[%s3079_s4 + $0x18] sm:$0xff] %v1710_v31  ;;  %v1696_v18 = vmul.f32 %v1639_v14, %v3382_v41  ;;  %v1634_v38 = vpop.permute.xlu0 %1633 }
 0x543   : > { %1724 = vst [vmem:[%s3079_s4 + $0x8] sm:$0xff] %v1708_v32  ;;  %v1695_v61 = vmul.f32 %v1634_v38, %v3384_v0 }
 0x544   : > { %v1712_v39 = vadd.f32 %v1696_v18, %v1600_v35 }
 0x545   : > { %v1711_v62 = vadd.f32 %v1695_v61, %v1599_v37  ;;  %v1649_v60 = vpop.permute.xlu1 %1648 }
 0x546   : > { %1728 = vst [vmem:[%s3079_s4 + $0x28] sm:$0xff] %v1712_v39  ;;  %v1698_v42 = vmul.f32 %v1649_v60, %v3388_v48  ;;  %v1644_v29 = vpop.permute.xlu0 %1643 }
 0x547   : > { %1727 = vst [vmem:[%s3079_s4 + $0x20] sm:$0xff] %v1711_v62  ;;  %v1697_v63 = vmul.f32 %v1644_v29, %v3390_v50  ;;  %v1606_v50 = vld [vmem:[%s3059_s3 + $0x58] sm:$0xff] }
 0x548   : > { %v1714_v33 = vadd.f32 %v1698_v42, %v1602_v40 }
 0x549   : > { %v1713_v36 = vadd.f32 %v1697_v63, %v1601_v44  ;;  %v1659_v46 = vpop.permute.xlu1 %1658 }
 0x54a   : > { %1730 = vst [vmem:[%s3079_s4 + $0x38] sm:$0xff] %v1714_v33  ;;  %v1700_v34 = vmul.f32 %v1659_v46, %v3394_v4  ;;  %v1654_v41 = vpop.permute.xlu0 %1653 }
 0x54b   : > { %1729 = vst [vmem:[%s3079_s4 + $0x30] sm:$0xff] %v1713_v36  ;;  %v1699_v0 = vmul.f32 %v1654_v41, %v3396_v51  ;;  %v1608_v51 = vld [vmem:[%s3059_s3 + $0x68] sm:$0xff] }
 0x54c   : > { %v1716_v48 = vadd.f32 %v1700_v34, %v1604_v45 }
 0x54d   : > { %v1715_v52 = vadd.f32 %v1699_v0, %v1603_v1  ;;  %v1669_v49 = vpop.permute.xlu1 %1668 }
 0x54e   : > { %1732 = vst [vmem:[%s3079_s4 + $0x48] sm:$0xff] %v1716_v48  ;;  %v1702_v8 = vmul.f32 %v1669_v49, %v3400_v53  ;;  %v1664_v55 = vpop.permute.xlu0 %1663 }
 0x54f   : > { %1731 = vst [vmem:[%s3079_s4 + $0x40] sm:$0xff] %v1715_v52  ;;  %v1701_v4 = vmul.f32 %v1664_v55, %v3402_v2 }
 0x550   : > { %v1718_v43 = vadd.f32 %v1702_v8, %v1606_v50 }
 0x551   : > { %v1717_v58 = vadd.f32 %v1701_v4, %v1605_v54  ;;  %v1679_v59 = vpop.permute.xlu1 %1678 }
 0x552   : > { %1734 = vst [vmem:[%s3079_s4 + $0x58] sm:$0xff] %v1718_v43  ;;  %v1704_v6 = vmul.f32 %v1679_v59, %v3406_v56  ;;  %v1674_v57 = vpop.permute.xlu0 %1673 }
 0x553   : > { %1733 = vst [vmem:[%s3079_s4 + $0x50] sm:$0xff] %v1717_v58  ;;  %v1703_v53 = vmul.f32 %v1674_v57, %v3408_v47 }
 0x554   : > { %v1720_v15 = vadd.f32 %v1704_v6, %v1608_v51 }
 0x555   : > { %v1719_v12 = vadd.f32 %v1703_v53, %v1607_v13  ;;  %v1689_v2 = vpop.permute.xlu1 %1688 }
 0x556   : > { %1736 = vst [vmem:[%s3079_s4 + $0x68] sm:$0xff] %v1720_v15  ;;  %v1706_v19 = vmul.f32 %v1689_v2, %v3412_v7  ;;  %v1684_v20 = vpop.permute.xlu0 %1683 }
 0x557   : > { %1735 = vst [vmem:[%s3079_s4 + $0x60] sm:$0xff] %v1719_v12  ;;  %v1705_v21 = vmul.f32 %v1684_v20, %v3414_v3 }
 0x558   : > { %v1722_v56 = vadd.f32 %v1706_v19, %v1610_v16 }
 0x559   : > { %v1721_v23 = vadd.f32 %v1705_v21, %v1609_v5 }
 0x55a   : > { %1738 = vst [vmem:[%s3079_s4 + $0x78] sm:$0xff] %v1722_v56 }
 0x55b   : > { %1737 = vst [vmem:[%s3079_s4 + $0x70] sm:$0xff] %v1721_v23 }
 0x55c PF: > { %s3646_s1 = sld [smem:[#allocation23_spill]]  ;;  %s1755_s24 = sshll.u32 %s3079_s4, 4  ;;  %s3469_s24 = int_to_ptr.vmem [resolvable:$true] %s1755_s24 }
 0x55d   : > { %s3647_s2 = sld [smem:[#allocation24_spill]]  ;;  %s1740_s29 = scalar_lea.sflag [#allocation8], %s3055_s14 }
 0x55e   : > { %s3649_s11 = sld [smem:[#allocation41_spill]]  ;;  %s2605_s27 = scalar_lea.vmem %s3469_s24, 2048 }
 0x55f   : > { %p2606_p10 = scmp.ne.s32.totalorder %s3469_s24, %s2605_s27  ;;  %s2763_s20 = smov [#allocation14]  }
 0x560   : > { %s2609_s4 = sshll.u32 %s2763_s20, 4  ;;  %s2610_s4 = int_to_ptr.vmem [resolvable:$false] %s2609_s4 }
 0x561   : > { %p2607_p0 = pnand %p2606_p10, %p3000_p7  ;;  %s2611_s19 = scalar_lea.vmem %s2610_s4, 4096 }
 0x562   : > { %s1986_s6 = sshll.u32 %s3646_s1, 4  ;;  %p2612_p3 = scmp.lt.s32.totalorder %s3469_s24, %s2610_s4 }
 0x563   : > { %s1987_s22 = sshll.u32 %s3647_s2, 5  ;;  %p2608_p1 = pneg %p2607_p0 }
 0x564   : > { %s1752_s25 = sadd.s32 %s1987_s22, %s1986_s6  ;;  %p2613_p8 = scmp.lt.s32.totalorder %s2611_s19, %s2605_s27 }
 0x565   : > { %s1988_s3 = sshll.u32 %s1752_s25, 7 }
 0x566   : > { %s3474_s17 = scalar_lea.hbm %s3649_s11, %s1988_s3  ;;  %p2614_p11 = por %p2613_p8, %p2612_p3 }
 0x568   : > { %p2615_p13 = pnand %p2614_p11, %p2608_p1 }
 0x56a   : > { %2618 = shalt.err (!%p2615_p13)
}
 0x56b   : > { %s2619_s13 = scalar_lea.hbm %s3474_s17, 2048  ;;  %s2623_s12 = scalar_lea.hbm %s3649_s11, 8192 }
 0x56c   : > { %p2620_p12 = scmp.ne.s32.totalorder %s3474_s17, %s2619_s13  ;;  %p2624_p6 = scmp.lt.s32.totalorder %s3474_s17, %s3649_s11 }
 0x56d   : > { %p2625_p2 = scmp.lt.s32.totalorder %s2623_s12, %s2619_s13 }
 0x56e   : > { %p2621_p4 = pnand %p2620_p12, %p3000_p7 }
 0x56f   : > { %p2626_p9 = por %p2625_p2, %p2624_p6 }
 0x570   : > { %p2622_p5 = pneg %p2621_p4 }
 0x572   : > { %p2627_p10 = pnand %p2626_p9, %p2622_p5 }
 0x574   : > { %2630 = shalt.err (!%p2627_p10)
}
 0x575   : > { %s2764_s6 = smov 128   ;;  %s2765_s22 = smov 8  }
 0x576   : > { %2224 = dma.vmem_to_hbm [thread:$0]  (%p3000_p7), %s3469_s24, 2048, %s3474_s17, %s1740_s29, %s2764_s6, %s2764_s6, %s2765_s22  }
 0x577 PF: > { %s3650_s25 = sld [smem:[#allocation20_spill]]  ;;  %p2247_p0 = scmp.ge.s32.totalorder %s2749_s9, 2 }
 0x578   : > { %s3651_s3 = sld [smem:[#allocation31_spill]] }
 0x57d   : > { %s1770_s7 = sand.u32 1, %s3650_s25  }
 0x57e   : > { %p3652_p1 = scmp.ne.s32.totalorder %s3651_s3, 0  ;;  %s1771_s18 = scalar_lea.sflag [#allocation8], %s1770_s7 }
 0x580   : > { %p2241_p3 = pnand %p2247_p0, %p3652_p1 }
 0x582   : > { %p2242_p8 = pneg %p2241_p3 }
 0x584   : > { %2696 = dma.done.wait (%p2242_p8), %s1771_s18, 2048  }
 0x585   : > { %2698 = vsyncadd (%p2242_p8), %s1771_s18, 4294965248  ;;  %s26_s9 = sadd.s32 1, %s2749_s9   ;;  %s3654_s14 = sld [smem:[#allocation19_spill]] }
 0x586   : > { %p3504_p11 = scmp.ge.s32.totalorder %s26_s9, 10   ;;  %s3655_s24 = sld [smem:[#allocation21_spill]] }
 0x587   : > { %s3656_s15 = smov %s3019_s21  ;;  %s3657_s17 = sld [smem:[#allocation25_spill]] }
 0x588   : > { %s3658_s7 = sld [smem:[#allocation33_spill]]  ;;  %s3659_s20 = smov %s3680_s28 }
 0x589   : > { %s3662_s22 = smov %s2709_s23  ;;  %s3663_s23 = smov %s3024_s5 }
 0x58a   : > { %s3664_s25 = smov %s2721_s26  ;;  %s3665_s26 = smov %s3656_s15 }
 0x58b   : > { %s3661_s21 = smov %s3654_s14  ;;  %s3666_s27 = smov %s2737_s30 }
 0x58c   : > { %s3668_s29 = smov %s2745_s8  ;;  %s3669_s30 = smov %s3672_s10 }
 0x58d   : > { %s3667_s28 = smov %s3657_s17  ;;  %s3670_s8 = smov %s3659_s20 }
 0x58e   :  { %25 = sbr.rel (!%p3504_p11) target bundleno = 21 (0x15), region = 125 }
 0x593   :  { %1776 = vsyncpa [#allocation7], 1 }
 0x594   :  { %1778 = vsyncpa [#allocation7 + $0x1], 1 }
 0x595   :  { %1779 = vsyncpa [#allocation10], 1 }
 0x596   :  { %1781 = vsyncpa [#allocation10 + $0x1], 1 }
 0x597   :  { %1782 = vsyncpa [#allocation13], 1 }
 0x598   :  { %1783 = vsyncpa [#allocation8], 1 }
 0x599   :  { %1785 = vsyncpa [#allocation8 + $0x1], 1 }

</bundles_post_ra>
